<compile_context>
chip_gen: v6e
topology: v6e:2x2x1
jax: 0.10.0
libtpu: 0.0.40
codegen_flags: <defaults>
</compile_context>

<pallas_src>
import jax
import jax.numpy as jnp
from jax import lax
from jax.experimental import pallas as pl
from jax.experimental.pallas import tpu as pltpu

IN_DIM = 5
HID = 512
OUT_DIM = 1


def _silu(x):
    # SiLU / swish: x * sigmoid(x).  exp and approx reciprocal both issue on
    # the EUP slot, keeping the VPU free for the bias-add / mul epilogue.
    return x * pl.reciprocal(1.0 + jnp.exp(-x), approx=True)


def critic_kernel(x_ref,
                  w1_ref, b1_ref,
                  w2_ref, b2_ref,
                  w3_ref, b3_ref,
                  w4t_ref, b4_ref,
                  o_ref):
    x = x_ref[...]                                            # [bt, 5] f32

    # Layer 1: tiny K=5 matmul (kept on the MXU; the kernel cost is dominated
    # by the two 512x512 layers below).
    h = jnp.dot(x, w1_ref[...], preferred_element_type=jnp.float32) + b1_ref[...]
    h = _silu(h)

    # Layers 2/3: bf16 activations x bf16 weights -> f32 accumulation.
    h = jnp.dot(h.astype(jnp.bfloat16), w2_ref[...],
                preferred_element_type=jnp.float32) + b2_ref[...]
    h = _silu(h)
    h = jnp.dot(h.astype(jnp.bfloat16), w3_ref[...],
                preferred_element_type=jnp.float32) + b3_ref[...]
    h = _silu(h)

    # Value head, lane-dense: contract w4^T [1, HID] with h [bt, HID] over the
    # hidden axis -> [1, bt] (batch in the lane dimension => unmasked store).
    out_row = lax.dot_general(
        w4t_ref[...], h,
        dimension_numbers=(((1,), (1,)), ((), ())),
        preferred_element_type=jnp.float32)                   # [1, bt]
    o_ref[...] = out_row + b4_ref[...]


def critic_forward(x, params, *, batch_tile=256):
    """x: [B, 5] float32 -> [B, 1] float32 (value head)."""
    B = x.shape[0]
    (w1, b1), (w2, b2), (w3, b3), (w4t, b4) = params

    if B <= batch_tile:
        bt, Bp = B, B               # one grid step covering the whole batch
        xp = x
    else:
        bt = batch_tile             # multiple of 128 -> lane-dense out blocks
        Bp = ((B + bt - 1) // bt) * bt
        xp = x if Bp == B else jnp.pad(x, ((0, Bp - B), (0, 0)))

    # Constant block index => Mosaic keeps the weights resident in VMEM across
    # grid iterations (single HBM fetch), no per-step re-DMA.
    const2d = lambda shape: pl.BlockSpec(shape, lambda i: (0, 0))

    out_row = pl.pallas_call(
        critic_kernel,
        out_shape=jax.ShapeDtypeStruct((1, Bp), jnp.float32),
        grid_spec=pltpu.PrefetchScalarGridSpec(
            num_scalar_prefetch=0,
            grid=(Bp // bt,),
            in_specs=[
                pl.BlockSpec((bt, IN_DIM), lambda i: (i, 0)),     # x tile
                const2d((IN_DIM, HID)),  const2d((1, HID)),       # layer 1
                const2d((HID, HID)),     const2d((1, HID)),       # layer 2 (bf16 w)
                const2d((HID, HID)),     const2d((1, HID)),       # layer 3 (bf16 w)
                const2d((OUT_DIM, HID)), const2d((1, OUT_DIM)),   # head (w4^T)
            ],
            out_specs=pl.BlockSpec((1, bt), lambda i: (0, i)),    # lane-dense row
        ),
        compiler_params=pltpu.CompilerParams(
            dimension_semantics=("parallel",)),
    )(xp, w1, b1, w2, b2, w3, b3, w4t, b4)

    return out_row.reshape(Bp, OUT_DIM)[:B]


def init_params(key):
    """PyTorch-Linear-like uniform fan-in init.

    w1/w2/w3 stored as [in, out]; head weight stored as w4^T = [1, HID].
    w2/w3 kept in bf16 (weight-traffic optimization); everything else f32."""
    def uniform(k, shape, fan_in, dtype=jnp.float32):
        bound = 1.0 / jnp.sqrt(jnp.float32(fan_in))
        return jax.random.uniform(k, shape, jnp.float32, -bound, bound).astype(dtype)

    key, k1w, k1b, k2w, k2b, k3w, k3b, k4w, k4b = jax.random.split(key, 9)
    w1 = uniform(k1w, (IN_DIM, HID), IN_DIM)
    b1 = uniform(k1b, (1, HID), IN_DIM)
    w2 = uniform(k2w, (HID, HID), HID, jnp.bfloat16)
    b2 = uniform(k2b, (1, HID), HID)
    w3 = uniform(k3w, (HID, HID), HID, jnp.bfloat16)
    b3 = uniform(k3b, (1, HID), HID)
    w4t = uniform(k4w, (OUT_DIM, HID), HID)
    b4 = uniform(k4b, (1, OUT_DIM), HID)
    return (w1, b1), (w2, b2), (w3, b3), (w4t, b4)


def critic_reference(x, params):
    """Pure-JAX reference with the same dtype policy as the kernel."""
    (w1, b1), (w2, b2), (w3, b3), (w4t, b4) = params
    h = jax.nn.silu(x @ w1 + b1)
    h = jax.nn.silu(jnp.dot(h.astype(jnp.bfloat16), w2,
                            preferred_element_type=jnp.float32) + b2)
    h = jax.nn.silu(jnp.dot(h.astype(jnp.bfloat16), w3,
                            preferred_element_type=jnp.float32) + b3)
    return jnp.dot(h, w4t.T, preferred_element_type=jnp.float32) + b4


if __name__ == "__main__":
    key = jax.random.PRNGKey(0)
    key, kx1, kx2 = jax.random.split(key, 3)
    params = init_params(key)

    # Small batch: single grid step covering the whole batch.
    x_small = jax.random.normal(kx1, (8, IN_DIM), jnp.float32)
    out_small = jax.block_until_ready(critic_forward(x_small, params))
    ref_small = critic_reference(x_small, params)
    assert out_small.shape == (8, OUT_DIM)
    assert jnp.allclose(out_small, ref_small, atol=2e-2, rtol=2e-2), "small-batch mismatch"

    # Larger ragged batch: 128-row tiles, zero padding, multi-step parallel grid.
    x_big = jax.random.normal(kx2, (300, IN_DIM), jnp.float32)
    out_big = jax.block_until_ready(critic_forward(x_big, params, batch_tile=128))
    ref_big = critic_reference(x_big, params)
    assert out_big.shape == (300, OUT_DIM)
    assert jnp.allclose(out_big, ref_big, atol=2e-2, rtol=2e-2), "tiled-batch mismatch"

    print("KERNEL_OK")
</pallas_src>

<mosaic_0001>
module attributes {stable_mosaic.version = 11 : i64} {
  func.func @critic_kernel(%arg0: i32, %arg1: memref<8x5xf32, #tpu.memory_space<vmem>>, %arg2: memref<5x512xf32, #tpu.memory_space<vmem>>, %arg3: memref<1x512xf32, #tpu.memory_space<vmem>>, %arg4: memref<512x512xbf16, #tpu.memory_space<vmem>>, %arg5: memref<1x512xf32, #tpu.memory_space<vmem>>, %arg6: memref<512x512xbf16, #tpu.memory_space<vmem>>, %arg7: memref<1x512xf32, #tpu.memory_space<vmem>>, %arg8: memref<1x512xf32, #tpu.memory_space<vmem>>, %arg9: memref<1x1xf32, #tpu.memory_space<vmem>>, %arg10: memref<1x8xf32, #tpu.memory_space<vmem>>) attributes {dimension_semantics = [#tpu.dimension_semantics<parallel>], iteration_bounds = array<i64: 1>, scalar_prefetch = 0 : i64, scratch_operands = 0 : i64, tpu.core_type = #tpu.core_type<tc>, window_params = [{transform_indices = @transform_0, window_bounds = array<i64: 8, 5>}, {pipeline_mode = #tpu.pipeline_mode<synchronous>, transform_indices = @transform_1, window_bounds = array<i64: 5, 512>}, {pipeline_mode = #tpu.pipeline_mode<synchronous>, transform_indices = @transform_2, window_bounds = array<i64: 1, 512>}, {pipeline_mode = #tpu.pipeline_mode<synchronous>, transform_indices = @transform_3, window_bounds = array<i64: 512, 512>}, {pipeline_mode = #tpu.pipeline_mode<synchronous>, transform_indices = @transform_4, window_bounds = array<i64: 1, 512>}, {pipeline_mode = #tpu.pipeline_mode<synchronous>, transform_indices = @transform_5, window_bounds = array<i64: 512, 512>}, {pipeline_mode = #tpu.pipeline_mode<synchronous>, transform_indices = @transform_6, window_bounds = array<i64: 1, 512>}, {pipeline_mode = #tpu.pipeline_mode<synchronous>, transform_indices = @transform_7, window_bounds = array<i64: 1, 512>}, {pipeline_mode = #tpu.pipeline_mode<synchronous>, transform_indices = @transform_8, window_bounds = array<i64: 1, 1>}, {transform_indices = @transform_9, window_bounds = array<i64: 1, 8>}]} {
    %c0 = arith.constant 0 : index
    %c0_0 = arith.constant 0 : index
    %0 = vector.load %arg1[%c0, %c0_0] : memref<8x5xf32, #tpu.memory_space<vmem>>, vector<8x5xf32>
    %c0_1 = arith.constant 0 : index
    %c0_2 = arith.constant 0 : index
    %1 = vector.load %arg2[%c0_1, %c0_2] : memref<5x512xf32, #tpu.memory_space<vmem>>, vector<5x512xf32>
    %cst = arith.constant dense<0.000000e+00> : vector<8x512xf32>
    %2 = tpu.matmul %0, %1, %cst {dimension_numbers = #tpu.dot_dimension_numbers<[1], [0], [0], [1], [0, 0, 1, 1], [], []>} : vector<8x5xf32>, vector<5x512xf32>, vector<8x512xf32> -> vector<8x512xf32>
    %c0_3 = arith.constant 0 : index
    %c0_4 = arith.constant 0 : index
    %3 = vector.load %arg3[%c0_3, %c0_4] : memref<1x512xf32, #tpu.memory_space<vmem>>, vector<1x512xf32>
    %4 = vector.broadcast %3 : vector<1x512xf32> to vector<8x512xf32>
    %5 = arith.addf %2, %4 : vector<8x512xf32>
    %cst_5 = arith.constant 0.000000e+00 : f32
    %6 = vector.broadcast %cst_5 : f32 to vector<8x512xf32>
    %7 = arith.subf %6, %5 : vector<8x512xf32>
    %8 = math.exp %7 : vector<8x512xf32>
    %cst_6 = arith.constant 1.000000e+00 : f32
    %9 = vector.broadcast %cst_6 : f32 to vector<8x512xf32>
    %10 = arith.addf %9, %8 : vector<8x512xf32>
    %11 = tpu.reciprocal %10 {approx = true} : vector<8x512xf32> -> vector<8x512xf32>
    %12 = arith.mulf %5, %11 : vector<8x512xf32>
    %13 = arith.truncf %12 : vector<8x512xf32> to vector<8x512xbf16>
    %c0_7 = arith.constant 0 : index
    %c0_8 = arith.constant 0 : index
    %14 = vector.load %arg4[%c0_7, %c0_8] : memref<512x512xbf16, #tpu.memory_space<vmem>>, vector<512x512xbf16>
    %cst_9 = arith.constant dense<0.000000e+00> : vector<8x512xf32>
    %15 = tpu.matmul %13, %14, %cst_9 {dimension_numbers = #tpu.dot_dimension_numbers<[1], [0], [0], [1], [0, 0, 1, 1], [], []>} : vector<8x512xbf16>, vector<512x512xbf16>, vector<8x512xf32> -> vector<8x512xf32>
    %c0_10 = arith.constant 0 : index
    %c0_11 = arith.constant 0 : index
    %16 = vector.load %arg5[%c0_10, %c0_11] : memref<1x512xf32, #tpu.memory_space<vmem>>, vector<1x512xf32>
    %17 = vector.broadcast %16 : vector<1x512xf32> to vector<8x512xf32>
    %18 = arith.addf %15, %17 : vector<8x512xf32>
    %cst_12 = arith.constant 0.000000e+00 : f32
    %19 = vector.broadcast %cst_12 : f32 to vector<8x512xf32>
    %20 = arith.subf %19, %18 : vector<8x512xf32>
    %21 = math.exp %20 : vector<8x512xf32>
    %cst_13 = arith.constant 1.000000e+00 : f32
    %22 = vector.broadcast %cst_13 : f32 to vector<8x512xf32>
    %23 = arith.addf %22, %21 : vector<8x512xf32>
    %24 = tpu.reciprocal %23 {approx = true} : vector<8x512xf32> -> vector<8x512xf32>
    %25 = arith.mulf %18, %24 : vector<8x512xf32>
    %26 = arith.truncf %25 : vector<8x512xf32> to vector<8x512xbf16>
    %c0_14 = arith.constant 0 : index
    %c0_15 = arith.constant 0 : index
    %27 = vector.load %arg6[%c0_14, %c0_15] : memref<512x512xbf16, #tpu.memory_space<vmem>>, vector<512x512xbf16>
    %cst_16 = arith.constant dense<0.000000e+00> : vector<8x512xf32>
    %28 = tpu.matmul %26, %27, %cst_16 {dimension_numbers = #tpu.dot_dimension_numbers<[1], [0], [0], [1], [0, 0, 1, 1], [], []>} : vector<8x512xbf16>, vector<512x512xbf16>, vector<8x512xf32> -> vector<8x512xf32>
    %c0_17 = arith.constant 0 : index
    %c0_18 = arith.constant 0 : index
    %29 = vector.load %arg7[%c0_17, %c0_18] : memref<1x512xf32, #tpu.memory_space<vmem>>, vector<1x512xf32>
    %30 = vector.broadcast %29 : vector<1x512xf32> to vector<8x512xf32>
    %31 = arith.addf %28, %30 : vector<8x512xf32>
    %cst_19 = arith.constant 0.000000e+00 : f32
    %32 = vector.broadcast %cst_19 : f32 to vector<8x512xf32>
    %33 = arith.subf %32, %31 : vector<8x512xf32>
    %34 = math.exp %33 : vector<8x512xf32>
    %cst_20 = arith.constant 1.000000e+00 : f32
    %35 = vector.broadcast %cst_20 : f32 to vector<8x512xf32>
    %36 = arith.addf %35, %34 : vector<8x512xf32>
    %37 = tpu.reciprocal %36 {approx = true} : vector<8x512xf32> -> vector<8x512xf32>
    %38 = arith.mulf %31, %37 : vector<8x512xf32>
    %c0_21 = arith.constant 0 : index
    %c0_22 = arith.constant 0 : index
    %39 = vector.load %arg8[%c0_21, %c0_22] : memref<1x512xf32, #tpu.memory_space<vmem>>, vector<1x512xf32>
    %cst_23 = arith.constant dense<0.000000e+00> : vector<1x8xf32>
    %40 = tpu.matmul %39, %38, %cst_23 {dimension_numbers = #tpu.dot_dimension_numbers<[1], [1], [0], [0], [0, 0, 1, 0], [], []>} : vector<1x512xf32>, vector<8x512xf32>, vector<1x8xf32> -> vector<1x8xf32>
    %c0_24 = arith.constant 0 : index
    %c0_25 = arith.constant 0 : index
    %41 = vector.load %arg9[%c0_24, %c0_25] : memref<1x1xf32, #tpu.memory_space<vmem>>, vector<1x1xf32>
    %42 = vector.broadcast %41 : vector<1x1xf32> to vector<1x8xf32>
    %43 = arith.addf %40, %42 : vector<1x8xf32>
    %c0_26 = arith.constant 0 : index
    %c0_27 = arith.constant 0 : index
    %44 = vector.load %arg10[%c0_26, %c0_27] : memref<1x8xf32, #tpu.memory_space<vmem>>, vector<1x8xf32>
    tpu.vector_store %arg10[%c0_26, %c0_27], %43 {strides = array<i32>} : memref<1x8xf32, #tpu.memory_space<vmem>>, vector<1x8xf32>,
    return
  }
  func.func @transform_0(%arg0: i32) -> (i32, i32) {
    %c0_i32 = arith.constant 0 : i32
    %c0_i32_0 = arith.constant 0 : i32
    return %arg0, %c0_i32 : i32, i32
  }
  func.func @transform_1(%arg0: i32) -> (i32, i32) {
    %c0_i32 = arith.constant 0 : i32
    %c0_i32_0 = arith.constant 0 : i32
    %c0_i32_1 = arith.constant 0 : i32
    return %c0_i32, %c0_i32_0 : i32, i32
  }
  func.func @transform_2(%arg0: i32) -> (i32, i32) {
    %c0_i32 = arith.constant 0 : i32
    %c0_i32_0 = arith.constant 0 : i32
    %c0_i32_1 = arith.constant 0 : i32
    return %c0_i32, %c0_i32_0 : i32, i32
  }
  func.func @transform_3(%arg0: i32) -> (i32, i32) {
    %c0_i32 = arith.constant 0 : i32
    %c0_i32_0 = arith.constant 0 : i32
    %c0_i32_1 = arith.constant 0 : i32
    return %c0_i32, %c0_i32_0 : i32, i32
  }
  func.func @transform_4(%arg0: i32) -> (i32, i32) {
    %c0_i32 = arith.constant 0 : i32
    %c0_i32_0 = arith.constant 0 : i32
    %c0_i32_1 = arith.constant 0 : i32
    return %c0_i32, %c0_i32_0 : i32, i32
  }
  func.func @transform_5(%arg0: i32) -> (i32, i32) {
    %c0_i32 = arith.constant 0 : i32
    %c0_i32_0 = arith.constant 0 : i32
    %c0_i32_1 = arith.constant 0 : i32
    return %c0_i32, %c0_i32_0 : i32, i32
  }
  func.func @transform_6(%arg0: i32) -> (i32, i32) {
    %c0_i32 = arith.constant 0 : i32
    %c0_i32_0 = arith.constant 0 : i32
    %c0_i32_1 = arith.constant 0 : i32
    return %c0_i32, %c0_i32_0 : i32, i32
  }
  func.func @transform_7(%arg0: i32) -> (i32, i32) {
    %c0_i32 = arith.constant 0 : i32
    %c0_i32_0 = arith.constant 0 : i32
    %c0_i32_1 = arith.constant 0 : i32
    return %c0_i32, %c0_i32_0 : i32, i32
  }
  func.func @transform_8(%arg0: i32) -> (i32, i32) {
    %c0_i32 = arith.constant 0 : i32
    %c0_i32_0 = arith.constant 0 : i32
    %c0_i32_1 = arith.constant 0 : i32
    return %c0_i32, %c0_i32_0 : i32, i32
  }
  func.func @transform_9(%arg0: i32) -> (i32, i32) {
    %c0_i32 = arith.constant 0 : i32
    %c0_i32_0 = arith.constant 0 : i32
    return %c0_i32, %arg0 : i32, i32
  }
}

</mosaic_0001>

<bundles_post_ra>
// kernel: tpu_custom_call.1
= control target key start
LH: loop header
LB: loop body
LE: loop exit
PB: predicated region body
PF: predicated region fallthrough
CT: control target
= control target key end

     0   :  { %s3438_s0 = inlined_call_operand.hbm [shape: f32[8,5], index: 0, kind: input, shape index: {}]   ;;  %s3439_s1 = inlined_call_operand.hbm [shape: f32[5,512], index: 1, kind: input, shape index: {}]   ;;  %s3440_s2 = inlined_call_operand.vmem [shape: f32[1,512], index: 2, kind: input, shape index: {}]   ;;  %s3441_s3 = inlined_call_operand.hbm [shape: bf16[512,512], index: 3, kind: input, shape index: {}]   ;;  %s3442_s4 = inlined_call_operand.vmem [shape: f32[1,512], index: 4, kind: input, shape index: {}]   ;;  %s3443_s5 = inlined_call_operand.hbm [shape: bf16[512,512], index: 5, kind: input, shape index: {}]   ;;  %s3444_s6 = inlined_call_operand.vmem [shape: f32[1,512], index: 6, kind: input, shape index: {}]   ;;  %s3445_s7 = inlined_call_operand.hbm [shape: f32[1,512], index: 7, kind: input, shape index: {}]   ;;  %s3446_s8 = inlined_call_operand.<no memory space> [shape: f32[1,1], index: 8, kind: input, shape index: {}]   ;;  %s3447_s9 = inlined_call_operand.hbm [shape: f32[1,8], index: 9, kind: output, shape index: {}]  }
   0x1   :  { %v14_v0 = vstv %s3446_s8 }
   0x2   :  { %15 = vst [vmem:[#allocation2] sm:$0x1] %v14_v0 }
   0x3   :  { %16 = vsyncpa [#allocation4], 0 }
   0x4   :  { %17 = vsyncpa [#allocation7], 0 }
   0x5   :  { %18 = vsyncpa [#allocation10], 0 }
   0x6   :  { %19 = vsyncpa [#allocation5], 0  ;;  %s3295_s11 = smov [#allocation6]  }
   0x7   :  { %s36_s12 = sshll.u32 %s3295_s11, 4  ;;  %s37_s12 = int_to_ptr.vmem [resolvable:$true] %s36_s12 }
   0x8   :  { %s3175_s13 = scalar_lea.vmem %s37_s12, 512  ;;  %p3180_p1 = scmp.lt.s32.totalorder %s37_s12, %s37_s12 }
   0x9   :  { %p3176_p0 = scmp.ne.s32.totalorder %s37_s12, %s3175_s13  ;;  %p3181_p2 = scmp.lt.s32.totalorder %s3175_s13, %s3175_s13 }
   0xb   :  { %p3182_p3 = por %p3181_p2, %p3180_p1 }
   0xd   :  { %p3183_p4 = pnand %p3182_p3, %p3176_p0 }
   0xf   :  { %3186 = shalt.err (!%p3183_p4)
}
  0x10   :  { %39 = dma.hbm_to_vmem [thread:$0]  %s3439_s1, 512, %s37_s12, [#allocation7]  }
  0x11   :  { %s3296_s8 = smov [#allocation9]   ;;  %s3297_s17 = smov [#allocation3]  }
  0x12   :  { %s61_s16 = sshll.u32 %s3296_s8, 4  ;;  %s26_s18 = sshll.u32 %s3297_s17, 4  ;;  %s62_s16 = int_to_ptr.vmem [resolvable:$true] %s61_s16  ;;  %s27_s18 = int_to_ptr.vmem [resolvable:$true] %s26_s18 }
  0x13   :  { %s3195_s19 = scalar_lea.vmem %s62_s16, 16384  ;;  %p3200_p6 = scmp.lt.s32.totalorder %s62_s16, %s62_s16 }
  0x14   :  { %p3196_p5 = scmp.ne.s32.totalorder %s62_s16, %s3195_s19  ;;  %p3201_p7 = scmp.lt.s32.totalorder %s3195_s19, %s3195_s19 }
  0x16   :  { %p3202_p8 = por %p3201_p7, %p3200_p6 }
  0x18   :  { %p3203_p9 = pnand %p3202_p8, %p3196_p5 }
  0x1a   :  { %3206 = shalt.err (!%p3203_p9)
}
  0x1b   :  { %s3298_s20 = smov 256   ;;  %s3299_s21 = smov 16  }
  0x1c   :  { %67 = dma.hbm_to_vmem [thread:$0]  %s3443_s5, 16384, %s62_s16, [#allocation10], %s3298_s20, %s3298_s20, %s3299_s21  }
  0x1d   :  { %s3215_s1 = scalar_lea.vmem %s27_s18, 128  ;;  %p3220_p11 = scmp.lt.s32.totalorder %s27_s18, %s27_s18 }
  0x1e   :  { %p3216_p10 = scmp.ne.s32.totalorder %s27_s18, %s3215_s1  ;;  %p3221_p12 = scmp.lt.s32.totalorder %s3215_s1, %s3215_s1 }
  0x20   :  { %p3222_p13 = por %p3221_p12, %p3220_p11 }
  0x22   :  { %p3223_p0 = pnand %p3222_p13, %p3216_p10 }
  0x24   :  { %3226 = shalt.err (!%p3223_p0)
}
  0x25   :  { %29 = dma.hbm_to_vmem [thread:$0]  %s3438_s0, 128, %s27_s18, [#allocation4]  }
  0x26   :  { %s3300_s26 = smov [#allocation8]   ;;  %s3301_s28 = smov [#allocation11]  }
  0x27   :  { %s47_s27 = sshll.u32 %s3300_s26, 4  ;;  %s76_s29 = sshll.u32 %s3301_s28, 4  ;;  %s48_s27 = int_to_ptr.vmem [resolvable:$true] %s47_s27  ;;  %s77_s29 = int_to_ptr.vmem [resolvable:$true] %s76_s29 }
  0x28   :  { %s3235_s30 = scalar_lea.vmem %s48_s27, 16384  ;;  %p3240_p2 = scmp.lt.s32.totalorder %s48_s27, %s48_s27 }
  0x29   :  { %p3236_p1 = scmp.ne.s32.totalorder %s48_s27, %s3235_s30  ;;  %p3241_p3 = scmp.lt.s32.totalorder %s3235_s30, %s3235_s30 }
  0x2b   :  { %p3242_p4 = por %p3241_p3, %p3240_p2 }
  0x2d   :  { %p3243_p5 = pnand %p3242_p4, %p3236_p1 }
  0x2f   :  { %3246 = shalt.err (!%p3243_p5)
}
  0x30   :  { %53 = dma.hbm_to_vmem [thread:$0]  %s3441_s3, 16384, %s48_s27, [#allocation7], %s3298_s20, %s3298_s20, %s3299_s21  }
  0x31   :  { %s3255_s11 = scalar_lea.vmem %s77_s29, 64  ;;  %p3260_p7 = scmp.lt.s32.totalorder %s77_s29, %s77_s29 }
  0x32   :  { %p3256_p6 = scmp.ne.s32.totalorder %s77_s29, %s3255_s11  ;;  %p3261_p8 = scmp.lt.s32.totalorder %s3255_s11, %s3255_s11 }
  0x34   :  { %p3262_p9 = por %p3261_p8, %p3260_p7 }
  0x36   :  { %p3263_p10 = pnand %p3262_p9, %p3256_p6 }
  0x38   :  { %3266 = shalt.err (!%p3263_p10)
}
  0x39   :  { %79 = dma.hbm_to_vmem [thread:$0]  %s3445_s7, 64, %s77_s29, [#allocation10]  }
  0x3a   :  { %3287 = dma.done.wait [#allocation4], 128  }
  0x3b   :  { %3288 = vsyncadd [#allocation4], 4294967168 }
  0x3c   :  { %3289 = dma.done.wait [#allocation7], 16896  }
  0x3d   :  { %3290 = vsyncadd [#allocation7], 4294950400 }
  0x3e   :  { %3291 = dma.done.wait [#allocation10], 16448  }
  0x3f   :  { %3292 = vsyncadd [#allocation10], 4294950848  ;;  %v3302_v1 = vmov 0.0   ;;  %vm128_vm0 = vcmask 1044480   ;;  %vm124_vm1 = vcmask 39936   ;;  %v97_v6 = vld [vmem:[#allocation3] sm:$0xff] }
  0x40   :  { %205 = vmatprep.mubr.f32.mxu0 %v3302_v1  ;;  %276 = vmatprep.mubr.f32.mxu1 %v3302_v1  ;;  %v99_v2 = vld [vmem:[#allocation6 + $0x8] sm:$0x1f]  ;;  %v101_v3 = vld [vmem:[#allocation6 + $0x18] sm:$0x1f]  ;;  %v98_v4 = vld [vmem:[#allocation6] sm:$0x1f] }
  0x41   :  { %2462 = vmatprep.subr.msk.mxu0 %vm128_vm0, %v99_v2  ;;  %2465 = vmatprep.subr.msk.mxu1 %vm128_vm0, %v101_v3  ;;  %v100_v5 = vld [vmem:[#allocation6 + $0x10] sm:$0x1f]  ;;  %vm2443_vm2 = vcmask 57344  }
  0x42   :  { %2463 = vmatpush1.msk.msra.mxu0 %vm128_vm0, %v98_v4  ;;  %2466 = vmatpush1.msk.msra.mxu1 %vm128_vm0, %v100_v5  ;;  %v2735_v7 = vld [vmem:[#allocation8 + $0xe0] ss:$16 sps:$4 sm:$0xff]   ;;  %v2737_v8 = vld [vmem:[#allocation8 + $0xe4] ss:$16 sps:$4 sm:$0xff]  }
  0x43   :  { %2464 = vmatmul.mubr.msk.f32.vlgmr.msra.gmra.mxu0 %vm124_vm1, %v97_v6  ;;  %2467 = vmatmul.mubr.msk.f32.vlgmr.msra.gmra.mxu1 %vm124_vm1, %v97_v6  ;;  %v2738_v9 = vld [vmem:[#allocation8 + $0x2e0] ss:$16 sps:$4 sm:$0xff]   ;;  %v2740_v10 = vld [vmem:[#allocation8 + $0x2e4] ss:$16 sps:$4 sm:$0xff]  }
  0x44   :  { %1101 = vmatprep.subr.bf16.mxu0 %v2737_v8  ;;  %v2741_v11 = vld [vmem:[#allocation8 + $0xc0] ss:$16 sps:$4 sm:$0xff]   ;;  %v2743_v12 = vld [vmem:[#allocation8 + $0xc4] ss:$16 sps:$4 sm:$0xff]   ;;  %1142 = vmatprep.subr.bf16.mxu1 %v2740_v10  ;;  %v2836_v8 = vld [vmem:[#allocation8 + $0x2ec] ss:$16 sps:$4 sm:$0xff]  }
  0x45   :  { %1102 = vmatpush1.bf16.msra.mxu0 %v2735_v7  ;;  %v2746_v13 = vld [vmem:[#allocation8 + $0x2c4] ss:$16 sps:$4 sm:$0xff]   ;;  %1143 = vmatpush1.bf16.msra.mxu1 %v2738_v9  ;;  %v2744_v14 = vld [vmem:[#allocation8 + $0x2c0] ss:$16 sps:$4 sm:$0xff]   ;;  %v2833_v7 = vld [vmem:[#allocation8 + $0xec] ss:$16 sps:$4 sm:$0xff]   ;;  %v104_v9 = vlaneseq }
  0x46   :  { %1103 = vmatprep.subr.bf16.mxu0 %v2743_v12  ;;  %1144 = vmatprep.subr.bf16.mxu1 %v2746_v13  ;;  %v2749_v15 = vld [vmem:[#allocation8 + $0xa4] ss:$16 sps:$4 sm:$0xff]   ;;  %v2747_v16 = vld [vmem:[#allocation8 + $0xa0] ss:$16 sps:$4 sm:$0xff]  }
  0x47   :  { %v2752_v17 = vld [vmem:[#allocation8 + $0x2a4] ss:$16 sps:$4 sm:$0xff]   ;;  %v2750_v19 = vld [vmem:[#allocation8 + $0x2a0] ss:$16 sps:$4 sm:$0xff]   ;;  %v105_v10 = vshrl.u32 %v104_v9, 7 }
  0x48   :  { %v2755_v18 = vld [vmem:[#allocation8 + $0x84] ss:$16 sps:$4 sm:$0xff]   ;;  %v2753_v21 = vld [vmem:[#allocation8 + $0x80] ss:$16 sps:$4 sm:$0xff]   ;;  %v2858_v9 = vld [vmem:[#allocation8 + $0x268] ss:$16 sps:$4 sm:$0xff]  }
  0x49   :  { %1104 = vmatpush1.bf16.msra.mxu0 %v2741_v11  ;;  %1145 = vmatpush1.bf16.msra.mxu1 %v2744_v14  ;;  %v2758_v20 = vld [vmem:[#allocation8 + $0x284] ss:$16 sps:$4 sm:$0xff]   ;;  %v2756_v23 = vld [vmem:[#allocation8 + $0x280] ss:$16 sps:$4 sm:$0xff]   ;;  %v3373_v11 = vsub.s32 0, %v105_v10  ;;  %v3375_v12 = vsub.s32 2, %v105_v10 }
  0x4a   :  { %1105 = vmatprep.subr.bf16.mxu0 %v2749_v15  ;;  %1146 = vmatprep.subr.bf16.mxu1 %v2752_v17  ;;  %v2761_v22 = vld [vmem:[#allocation8 + $0x64] ss:$16 sps:$4 sm:$0xff]   ;;  %v2759_v25 = vld [vmem:[#allocation8 + $0x60] ss:$16 sps:$4 sm:$0xff]   ;;  %v3380_v14 = vsub.s32 1, %v105_v10  ;;  %v3382_v15 = vsub.s32 3, %v105_v10 }
  0x4b   :  { %v2764_v24 = vld [vmem:[#allocation8 + $0x264] ss:$16 sps:$4 sm:$0xff]   ;;  %v2762_v26 = vld [vmem:[#allocation8 + $0x260] ss:$16 sps:$4 sm:$0xff]   ;;  %v2863_v10 = vld [vmem:[#allocation8 + $0x4c] ss:$16 sps:$4 sm:$0xff]  }
  0x4c   :  { %v2767_v27 = vld [vmem:[#allocation8 + $0x44] ss:$16 sps:$4 sm:$0xff]   ;;  %v2765_v29 = vld [vmem:[#allocation8 + $0x40] ss:$16 sps:$4 sm:$0xff]  }
  0x4d   :  { %1106 = vmatpush1.bf16.msra.mxu0 %v2747_v16  ;;  %1147 = vmatpush1.bf16.msra.mxu1 %v2750_v19  ;;  %v2770_v28 = vld [vmem:[#allocation8 + $0x244] ss:$16 sps:$4 sm:$0xff]   ;;  %v2768_v30 = vld [vmem:[#allocation8 + $0x240] ss:$16 sps:$4 sm:$0xff]  }
  0x4e   :  { %1107 = vmatprep.subr.bf16.mxu0 %v2755_v18  ;;  %1148 = vmatprep.subr.bf16.mxu1 %v2758_v20  ;;  %v2773_v31 = vld [vmem:[#allocation8 + $0x24] ss:$16 sps:$4 sm:$0xff]   ;;  %v2771_v33 = vld [vmem:[#allocation8 + $0x20] ss:$16 sps:$4 sm:$0xff]  }
  0x4f   :  { %v2776_v32 = vld [vmem:[#allocation8 + $0x224] ss:$16 sps:$4 sm:$0xff]   ;;  %v2774_v34 = vld [vmem:[#allocation8 + $0x220] ss:$16 sps:$4 sm:$0xff]  }
  0x50   :  { %v2779_v35 = vld [vmem:[#allocation8 + $0x4] ss:$16 sps:$4 sm:$0xff]   ;;  %v2777_v37 = vld [vmem:[#allocation8] ss:$16 sps:$4 sm:$0xff]  }
  0x51   :  { %1108 = vmatpush1.bf16.msra.mxu0 %v2753_v21  ;;  %1149 = vmatpush1.bf16.msra.mxu1 %v2756_v23  ;;  %v2782_v36 = vld [vmem:[#allocation8 + $0x204] ss:$16 sps:$4 sm:$0xff]   ;;  %v2780_v38 = vld [vmem:[#allocation8 + $0x200] ss:$16 sps:$4 sm:$0xff]  }
  0x52   :  { %1109 = vmatprep.subr.bf16.mxu0 %v2761_v22  ;;  %1150 = vmatprep.subr.bf16.mxu1 %v2764_v24  ;;  %v2785_v39 = vld [vmem:[#allocation8 + $0x1e4] ss:$16 sps:$4 sm:$0xff]   ;;  %v2783_v41 = vld [vmem:[#allocation8 + $0x1e0] ss:$16 sps:$4 sm:$0xff]  }
  0x53   :  { %v2788_v40 = vld [vmem:[#allocation8 + $0x3e4] ss:$16 sps:$4 sm:$0xff]   ;;  %v2786_v42 = vld [vmem:[#allocation8 + $0x3e0] ss:$16 sps:$4 sm:$0xff]  }
  0x54   :  { %v2791_v43 = vld [vmem:[#allocation8 + $0x1c4] ss:$16 sps:$4 sm:$0xff]   ;;  %v2789_v45 = vld [vmem:[#allocation8 + $0x1c0] ss:$16 sps:$4 sm:$0xff]  }
  0x55   :  { %1110 = vmatpush1.bf16.msra.mxu0 %v2759_v25  ;;  %1151 = vmatpush1.bf16.msra.mxu1 %v2762_v26  ;;  %v2794_v44 = vld [vmem:[#allocation8 + $0x3c4] ss:$16 sps:$4 sm:$0xff]   ;;  %v2792_v46 = vld [vmem:[#allocation8 + $0x3c0] ss:$16 sps:$4 sm:$0xff]  }
  0x56   :  { %1111 = vmatprep.subr.bf16.mxu0 %v2767_v27  ;;  %1152 = vmatprep.subr.bf16.mxu1 %v2770_v28  ;;  %v2797_v47 = vld [vmem:[#allocation8 + $0x1a4] ss:$16 sps:$4 sm:$0xff]   ;;  %v2795_v49 = vld [vmem:[#allocation8 + $0x1a0] ss:$16 sps:$4 sm:$0xff]  }
  0x57   :  { %v2800_v48 = vld [vmem:[#allocation8 + $0x3a4] ss:$16 sps:$4 sm:$0xff]   ;;  %v2798_v50 = vld [vmem:[#allocation8 + $0x3a0] ss:$16 sps:$4 sm:$0xff]  }
  0x58   :  { %v2803_v51 = vld [vmem:[#allocation8 + $0x184] ss:$16 sps:$4 sm:$0xff]   ;;  %v2801_v53 = vld [vmem:[#allocation8 + $0x180] ss:$16 sps:$4 sm:$0xff]  }
  0x59   :  { %1112 = vmatpush1.bf16.msra.mxu0 %v2765_v29  ;;  %1153 = vmatpush1.bf16.msra.mxu1 %v2768_v30  ;;  %v2806_v52 = vld [vmem:[#allocation8 + $0x384] ss:$16 sps:$4 sm:$0xff]   ;;  %v2804_v54 = vld [vmem:[#allocation8 + $0x380] ss:$16 sps:$4 sm:$0xff]  }
  0x5a   :  { %1113 = vmatprep.subr.bf16.mxu0 %v2773_v31  ;;  %1154 = vmatprep.subr.bf16.mxu1 %v2776_v32  ;;  %v2809_v55 = vld [vmem:[#allocation8 + $0x164] ss:$16 sps:$4 sm:$0xff]   ;;  %v2807_v57 = vld [vmem:[#allocation8 + $0x160] ss:$16 sps:$4 sm:$0xff]  }
  0x5b   :  { %v2812_v56 = vld [vmem:[#allocation8 + $0x364] ss:$16 sps:$4 sm:$0xff]   ;;  %v2810_v58 = vld [vmem:[#allocation8 + $0x360] ss:$16 sps:$4 sm:$0xff]  }
  0x5c   :  { %v2815_v59 = vld [vmem:[#allocation8 + $0x144] ss:$16 sps:$4 sm:$0xff]   ;;  %v2813_v61 = vld [vmem:[#allocation8 + $0x140] ss:$16 sps:$4 sm:$0xff]  }
  0x5d   :  { %1114 = vmatpush1.bf16.msra.mxu0 %v2771_v33  ;;  %1155 = vmatpush1.bf16.msra.mxu1 %v2774_v34  ;;  %v2818_v60 = vld [vmem:[#allocation8 + $0x344] ss:$16 sps:$4 sm:$0xff]   ;;  %v2816_v62 = vld [vmem:[#allocation8 + $0x340] ss:$16 sps:$4 sm:$0xff]  }
  0x5e   :  { %1115 = vmatprep.subr.bf16.mxu0 %v2779_v35  ;;  %1156 = vmatprep.subr.bf16.mxu1 %v2782_v36  ;;  %v2821_v63 = vld [vmem:[#allocation8 + $0x124] ss:$16 sps:$4 sm:$0xff]   ;;  %v2819_v1 = vld [vmem:[#allocation8 + $0x120] ss:$16 sps:$4 sm:$0xff]  }
  0x5f   :  { %v2824_v0 = vld [vmem:[#allocation8 + $0x324] ss:$16 sps:$4 sm:$0xff]   ;;  %v2822_v2 = vld [vmem:[#allocation8 + $0x320] ss:$16 sps:$4 sm:$0xff]  }
  0x60   :  { %v2827_v3 = vld [vmem:[#allocation8 + $0x104] ss:$16 sps:$4 sm:$0xff]   ;;  %v2825_v5 = vld [vmem:[#allocation8 + $0x100] ss:$16 sps:$4 sm:$0xff]  }
  0x61   :  { %1116 = vmatpush1.bf16.msra.mxu0 %v2777_v37  ;;  %1157 = vmatpush1.bf16.msra.mxu1 %v2780_v38  ;;  %v2830_v4 = vld [vmem:[#allocation8 + $0x304] ss:$16 sps:$4 sm:$0xff]   ;;  %v2828_v6 = vld [vmem:[#allocation8 + $0x300] ss:$16 sps:$4 sm:$0xff]  }
  0x62   :  { %1117 = vmatprep.subr.bf16.mxu0 %v2785_v39  ;;  %1158 = vmatprep.subr.bf16.mxu1 %v2788_v40  ;;  %v102_v13 = vld [vmem:[%s3440_s2] sm:$0xf] }
  0x63   :  { %v107_v16 = vrot.slane %v102_v13, %v3373_v11  ;;  %v115_v17 = vrot.slane %v102_v13, %v3375_v12  ;;  %v111_v18 = vrot.slane %v102_v13, %v3380_v14  ;;  %v119_v19 = vrot.slane %v102_v13, %v3382_v15  ;;  %v2866_v13 = vld [vmem:[#allocation8 + $0x24c] ss:$16 sps:$4 sm:$0xff]  }
  0x65   :  { %1118 = vmatpush2.bf16.msra.mxu0 %v2783_v41  ;;  %1159 = vmatpush2.bf16.msra.mxu1 %v2786_v42 }
  0x66   :  { %1119 = vmatprep.subr.bf16.mxu0 %v2791_v43  ;;  %1160 = vmatprep.subr.bf16.mxu1 %v2794_v44 }
  0x69   :  { %1120 = vmatpush2.bf16.msra.mxu0 %v2789_v45  ;;  %1161 = vmatpush2.bf16.msra.mxu1 %v2792_v46 }
  0x6a   :  { %1121 = vmatprep.subr.bf16.mxu0 %v2797_v47  ;;  %1162 = vmatprep.subr.bf16.mxu1 %v2800_v48 }
  0x6d   :  { %1122 = vmatpush2.bf16.msra.mxu0 %v2795_v49  ;;  %1163 = vmatpush2.bf16.msra.mxu1 %v2798_v50 }
  0x6e   :  { %1123 = vmatprep.subr.bf16.mxu0 %v2803_v51  ;;  %1164 = vmatprep.subr.bf16.mxu1 %v2806_v52 }
  0x71   :  { %1124 = vmatpush2.bf16.msra.mxu0 %v2801_v53  ;;  %1165 = vmatpush2.bf16.msra.mxu1 %v2804_v54  ;;  %v2831_v53 = vld [vmem:[#allocation8 + $0xe8] ss:$16 sps:$4 sm:$0xff]  }
  0x72   :  { %1125 = vmatprep.subr.bf16.mxu0 %v2809_v55  ;;  %1166 = vmatprep.subr.bf16.mxu1 %v2812_v56  ;;  %v2834_v56 = vld [vmem:[#allocation8 + $0x2e8] ss:$16 sps:$4 sm:$0xff]  }
  0x75   :  { %1126 = vmatpush2.bf16.msra.mxu0 %v2807_v57  ;;  %1167 = vmatpush2.bf16.msra.mxu1 %v2810_v58  ;;  %v2839_v58 = vld [vmem:[#allocation8 + $0xcc] ss:$16 sps:$4 sm:$0xff]  }
  0x76   :  { %1127 = vmatprep.subr.bf16.mxu0 %v2815_v59  ;;  %1168 = vmatprep.subr.bf16.mxu1 %v2818_v60  ;;  %v2842_v59 = vld [vmem:[#allocation8 + $0x2cc] ss:$16 sps:$4 sm:$0xff]   ;;  %v2837_v60 = vld [vmem:[#allocation8 + $0xc8] ss:$16 sps:$4 sm:$0xff]  }
  0x79   :  { %1128 = vmatpush2.bf16.msra.mxu0 %v2813_v61  ;;  %1169 = vmatpush2.bf16.msra.mxu1 %v2816_v62  ;;  %v2840_v61 = vld [vmem:[#allocation8 + $0x2c8] ss:$16 sps:$4 sm:$0xff]   ;;  %v2845_v62 = vld [vmem:[#allocation8 + $0xac] ss:$16 sps:$4 sm:$0xff]  }
  0x7a   :  { %1129 = vmatprep.subr.bf16.mxu0 %v2821_v63  ;;  %1170 = vmatprep.subr.bf16.mxu1 %v2824_v0  ;;  %v2848_v63 = vld [vmem:[#allocation8 + $0x2ac] ss:$16 sps:$4 sm:$0xff]   ;;  %v2843_v0 = vld [vmem:[#allocation8 + $0xa8] ss:$16 sps:$4 sm:$0xff]  }
  0x7d   :  { %1130 = vmatpush2.bf16.msra.mxu0 %v2819_v1  ;;  %1171 = vmatpush2.bf16.msra.mxu1 %v2822_v2  ;;  %v2846_v1 = vld [vmem:[#allocation8 + $0x2a8] ss:$16 sps:$4 sm:$0xff]   ;;  %v2851_v2 = vld [vmem:[#allocation8 + $0x8c] ss:$16 sps:$4 sm:$0xff]  }
  0x7e   :  { %1131 = vmatprep.subr.bf16.mxu0 %v2827_v3  ;;  %1172 = vmatprep.subr.bf16.mxu1 %v2830_v4  ;;  %v2854_v3 = vld [vmem:[#allocation8 + $0x28c] ss:$16 sps:$4 sm:$0xff]   ;;  %v2849_v4 = vld [vmem:[#allocation8 + $0x88] ss:$16 sps:$4 sm:$0xff]  }
  0x81   :  { %1132 = vmatpush2.bf16.msra.mxu0 %v2825_v5  ;;  %1173 = vmatpush2.bf16.msra.mxu1 %v2828_v6  ;;  %v2852_v5 = vld [vmem:[#allocation8 + $0x288] ss:$16 sps:$4 sm:$0xff]   ;;  %v2857_v6 = vld [vmem:[#allocation8 + $0x6c] ss:$16 sps:$4 sm:$0xff]  }
  0x82   :  { %1183 = vmatprep.subr.bf16.mxu0 %v2833_v7  ;;  %1224 = vmatprep.subr.bf16.mxu1 %v2836_v8  ;;  %v2860_v7 = vld [vmem:[#allocation8 + $0x26c] ss:$16 sps:$4 sm:$0xff]   ;;  %v2855_v8 = vld [vmem:[#allocation8 + $0x68] ss:$16 sps:$4 sm:$0xff]  }
 0x103   :  { %v207_v20 = vpop.f32.mrf.mxu0  ;;  %v278_v21 = vpop.f32.mrf.mxu1 }
 0x104   :  { %v208_v22 = vadd.f32 %v207_v20, %v107_v16  ;;  %v279_v23 = vadd.f32 %v278_v21, %v115_v17  ;;  %v2861_v16 = vld [vmem:[#allocation8 + $0x48] ss:$16 sps:$4 sm:$0xff]  }
 0x105   :  { %v209_v24 = vpop.f32.mrf.mxu0  ;;  %v280_v25 = vpop.f32.mrf.mxu1  ;;  %v2864_v17 = vld [vmem:[#allocation8 + $0x248] ss:$16 sps:$4 sm:$0xff]  }
 0x106   :  { %v283_v26 = vsub.f32 0.0, %v208_v22  ;;  %v285_v27 = vsub.f32 0.0, %v279_v23  ;;  %v210_v28 = vadd.f32 %v209_v24, %v111_v18  ;;  %v281_v29 = vadd.f32 %v280_v25, %v119_v19  ;;  %v2869_v18 = vld [vmem:[#allocation8 + $0x2c] ss:$16 sps:$4 sm:$0xff]   ;;  %v2867_v20 = vld [vmem:[#allocation8 + $0x28] ss:$16 sps:$4 sm:$0xff]  }
 0x107   :  { %v2872_v19 = vld [vmem:[#allocation8 + $0x22c] ss:$16 sps:$4 sm:$0xff]   ;;  %v2870_v21 = vld [vmem:[#allocation8 + $0x228] ss:$16 sps:$4 sm:$0xff]  }
 0x108   :  { %v287_v30 = vmul.f32 1.442695, %v283_v26  ;;  %v291_v31 = vmul.f32 1.442695, %v285_v27  ;;  %v284_v32 = vsub.f32 0.0, %v210_v28  ;;  %v286_v33 = vsub.f32 0.0, %v281_v29 }
 0x109   :  { %v2873_v24 = vld [vmem:[#allocation8 + $0x8] ss:$16 sps:$4 sm:$0xff]   ;;  %v2881_v26 = vld [vmem:[#allocation8 + $0x1ec] ss:$16 sps:$4 sm:$0xff]  }
 0x10a   :  { %3119 = vpow2.f32 %v287_v30  ;;  %v289_v34 = vmul.f32 1.442695, %v284_v32  ;;  %v293_v35 = vmul.f32 1.442695, %v286_v33  ;;  %v2876_v25 = vld [vmem:[#allocation8 + $0x208] ss:$16 sps:$4 sm:$0xff]  }
 0x10b   :  { %3121 = vpow2.f32 %v291_v31  ;;  %v2884_v27 = vld [vmem:[#allocation8 + $0x3ec] ss:$16 sps:$4 sm:$0xff]   ;;  %v2885_v32 = vld [vmem:[#allocation8 + $0x1c8] ss:$16 sps:$4 sm:$0xff]  }
 0x10c   :  { %3123 = vpow2.f32 %v289_v34  ;;  %v2887_v30 = vld [vmem:[#allocation8 + $0x1cc] ss:$16 sps:$4 sm:$0xff]   ;;  %v2888_v33 = vld [vmem:[#allocation8 + $0x3c8] ss:$16 sps:$4 sm:$0xff]  }
 0x10d   :  { %3125 = vpow2.f32 %v293_v35  ;;  %v2890_v31 = vld [vmem:[#allocation8 + $0x3cc] ss:$16 sps:$4 sm:$0xff]  }
 0x10e   :  { %v2893_v34 = vld [vmem:[#allocation8 + $0x1ac] ss:$16 sps:$4 sm:$0xff]  }
 0x10f   :  { %v2896_v35 = vld [vmem:[#allocation8 + $0x3ac] ss:$16 sps:$4 sm:$0xff]  }
 0x117   :  { %v3120_v36 = vpop.eup %3119 }
 0x118   :  { %v3122_v37 = vpop.eup %3121  ;;  %v295_v38 = vadd.f32 1.0, %v3120_v36  ;;  %v2891_v36 = vld [vmem:[#allocation8 + $0x1a8] ss:$16 sps:$4 sm:$0xff]  }
 0x119   :  { %v3124_v39 = vpop.eup %3123  ;;  %v297_v40 = vadd.f32 1.0, %v3122_v37  ;;  %v2894_v37 = vld [vmem:[#allocation8 + $0x3a8] ss:$16 sps:$4 sm:$0xff]  }
 0x11a   :  { %v3126_v41 = vpop.eup %3125  ;;  %3127 = vrcp.f32 %v295_v38  ;;  %v296_v42 = vadd.f32 1.0, %v3124_v39  ;;  %v2899_v38 = vld [vmem:[#allocation8 + $0x18c] ss:$16 sps:$4 sm:$0xff]  }
 0x11b   :  { %3129 = vrcp.f32 %v297_v40  ;;  %v298_v43 = vadd.f32 1.0, %v3126_v41  ;;  %v2902_v39 = vld [vmem:[#allocation8 + $0x38c] ss:$16 sps:$4 sm:$0xff]   ;;  %v2897_v40 = vld [vmem:[#allocation8 + $0x188] ss:$16 sps:$4 sm:$0xff]  }
 0x11c   :  { %3131 = vrcp.f32 %v296_v42  ;;  %v2900_v41 = vld [vmem:[#allocation8 + $0x388] ss:$16 sps:$4 sm:$0xff]   ;;  %v2905_v42 = vld [vmem:[#allocation8 + $0x16c] ss:$16 sps:$4 sm:$0xff]  }
 0x11d   :  { %3133 = vrcp.f32 %v298_v43  ;;  %v2908_v43 = vld [vmem:[#allocation8 + $0x36c] ss:$16 sps:$4 sm:$0xff]  }
 0x127   :  { %v3128_v44 = vpop.eup %3127 }
 0x128   :  { %v3130_v45 = vpop.eup %3129  ;;  %v303_v47 = vmul.f32 %v3128_v44, %v208_v22  ;;  %v2875_v22 = vld [vmem:[#allocation8 + $0xc] ss:$16 sps:$4 sm:$0xff]   ;;  %v2903_v44 = vld [vmem:[#allocation8 + $0x168] ss:$16 sps:$4 sm:$0xff]  }
 0x129   :  { %v3132_v46 = vpop.eup %3131  ;;  %v305_v49 = vmul.f32 %v3130_v45, %v279_v23  ;;  %v2878_v23 = vld [vmem:[#allocation8 + $0x20c] ss:$16 sps:$4 sm:$0xff]   ;;  %v2906_v45 = vld [vmem:[#allocation8 + $0x368] ss:$16 sps:$4 sm:$0xff]  }
 0x12a   :  { %v3134_v48 = vpop.eup %3133  ;;  %v304_v50 = vmul.f32 %v3132_v46, %v210_v28  ;;  %v3388_v54 = vpack.c.bf16 %v303_v47, %v303_v47  ;;  %v2879_v28 = vld [vmem:[#allocation8 + $0x1e8] ss:$16 sps:$4 sm:$0xff]   ;;  %v2911_v46 = vld [vmem:[#allocation8 + $0x14c] ss:$16 sps:$4 sm:$0xff]  }
 0x12b   :  { %v306_v51 = vmul.f32 %v3134_v48, %v281_v29  ;;  %v3390_v57 = vpack.c.bf16 %v305_v49, %v305_v49  ;;  %v2882_v29 = vld [vmem:[#allocation8 + $0x3e8] ss:$16 sps:$4 sm:$0xff]   ;;  %v2914_v47 = vld [vmem:[#allocation8 + $0x34c] ss:$16 sps:$4 sm:$0xff]  }
 0x12c   :  { %v308_v52 = vpack.c.bf16 %v304_v50, %v304_v50  ;;  %v2909_v48 = vld [vmem:[#allocation8 + $0x148] ss:$16 sps:$4 sm:$0xff]   ;;  %v2917_v50 = vld [vmem:[#allocation8 + $0x12c] ss:$16 sps:$4 sm:$0xff]  }
 0x12d   :  { %v310_v55 = vpack.c.bf16 %v306_v51, %v306_v51  ;;  %v2912_v49 = vld [vmem:[#allocation8 + $0x348] ss:$16 sps:$4 sm:$0xff]   ;;  %v2920_v51 = vld [vmem:[#allocation8 + $0x32c] ss:$16 sps:$4 sm:$0xff]  }
 0x12e   :  { %1133 = vmatprep.mubr.bf16.mxu0 %v308_v52 }
 0x12f   :  { %1174 = vmatprep.mubr.bf16.mxu1 %v310_v55  ;;  %1134 = vmatmul.mubr.bf16.vlgmr.msra.gmra.mxu0 %v3388_v54 }
 0x130   :  { %1175 = vmatmul.mubr.bf16.vlgmr.msra.gmra.mxu1 %v3390_v57  ;;  %1184 = vmatpush1.bf16.msra.mxu0 %v2831_v53  ;;  %v2918_v53 = vld [vmem:[#allocation8 + $0x328] ss:$16 sps:$4 sm:$0xff]  }
 0x131   :  { %1225 = vmatpush1.bf16.msra.mxu1 %v2834_v56  ;;  %1215 = vmatprep.mubr.bf16.mxu0 %v308_v52  ;;  %v2915_v52 = vld [vmem:[#allocation8 + $0x128] ss:$16 sps:$4 sm:$0xff]   ;;  %v2926_v56 = vld [vmem:[#allocation8 + $0x30c] ss:$16 sps:$4 sm:$0xff]  }
 0x132   :  { %1256 = vmatprep.mubr.bf16.mxu1 %v310_v55  ;;  %1185 = vmatprep.subr.bf16.mxu0 %v2839_v58  ;;  %v2923_v55 = vld [vmem:[#allocation8 + $0x10c] ss:$16 sps:$4 sm:$0xff]   ;;  %v2921_v58 = vld [vmem:[#allocation8 + $0x108] ss:$16 sps:$4 sm:$0xff]  }
 0x133   :  { %1226 = vmatprep.subr.bf16.mxu1 %v2842_v59  ;;  %v2924_v59 = vld [vmem:[#allocation8 + $0x308] ss:$16 sps:$4 sm:$0xff]  }
 0x134   :  { %1186 = vmatpush1.bf16.msra.mxu0 %v2837_v60  ;;  %v2929_v60 = vld [vmem:[#allocation9 + $0xe4] ss:$16 sps:$4 sm:$0xff]  }
 0x135   :  { %1227 = vmatpush1.bf16.msra.mxu1 %v2840_v61  ;;  %1187 = vmatprep.subr.bf16.mxu0 %v2845_v62  ;;  %v2927_v61 = vld [vmem:[#allocation9 + $0xe0] ss:$16 sps:$4 sm:$0xff]   ;;  %v2932_v62 = vld [vmem:[#allocation9 + $0xc4] ss:$16 sps:$4 sm:$0xff]  }
 0x136   :  { %1228 = vmatprep.subr.bf16.mxu1 %v2848_v63  ;;  %v2930_v63 = vld [vmem:[#allocation9 + $0xc0] ss:$16 sps:$4 sm:$0xff]  }
 0x138   :  { %1188 = vmatpush1.bf16.msra.mxu0 %v2843_v0  ;;  %v2935_v0 = vld [vmem:[#allocation9 + $0xa4] ss:$16 sps:$4 sm:$0xff]  }
 0x139   :  { %1229 = vmatpush1.bf16.msra.mxu1 %v2846_v1  ;;  %1189 = vmatprep.subr.bf16.mxu0 %v2851_v2  ;;  %v2933_v1 = vld [vmem:[#allocation9 + $0xa0] ss:$16 sps:$4 sm:$0xff]   ;;  %v2938_v2 = vld [vmem:[#allocation9 + $0x84] ss:$16 sps:$4 sm:$0xff]  }
 0x13a   :  { %1230 = vmatprep.subr.bf16.mxu1 %v2854_v3  ;;  %v2936_v3 = vld [vmem:[#allocation9 + $0x80] ss:$16 sps:$4 sm:$0xff]  }
 0x13c   :  { %1190 = vmatpush1.bf16.msra.mxu0 %v2849_v4  ;;  %v2941_v4 = vld [vmem:[#allocation9 + $0x64] ss:$16 sps:$4 sm:$0xff]  }
 0x13d   :  { %1231 = vmatpush1.bf16.msra.mxu1 %v2852_v5  ;;  %1191 = vmatprep.subr.bf16.mxu0 %v2857_v6  ;;  %v2939_v5 = vld [vmem:[#allocation9 + $0x60] ss:$16 sps:$4 sm:$0xff]   ;;  %v2944_v6 = vld [vmem:[#allocation9 + $0x44] ss:$16 sps:$4 sm:$0xff]  }
 0x13e   :  { %1232 = vmatprep.subr.bf16.mxu1 %v2860_v7  ;;  %v2945_v7 = vld [vmem:[#allocation9 + $0x20] ss:$16 sps:$4 sm:$0xff]  }
 0x140   :  { %1192 = vmatpush1.bf16.msra.mxu0 %v2855_v8  ;;  %v2950_v8 = vld [vmem:[#allocation9 + $0x4] ss:$16 sps:$4 sm:$0xff]  }
 0x141   :  { %1233 = vmatpush1.bf16.msra.mxu1 %v2858_v9  ;;  %1193 = vmatprep.subr.bf16.mxu0 %v2863_v10  ;;  %v2948_v9 = vld [vmem:[#allocation9] ss:$16 sps:$4 sm:$0xff]   ;;  %v2953_v10 = vld [vmem:[#allocation9 + $0x1e4] ss:$16 sps:$4 sm:$0xff]  }
 0x142   :  { %1234 = vmatprep.subr.bf16.mxu1 %v2866_v13  ;;  %v2951_v13 = vld [vmem:[#allocation9 + $0x1e0] ss:$16 sps:$4 sm:$0xff]  }
 0x144   :  { %1194 = vmatpush1.bf16.msra.mxu0 %v2861_v16  ;;  %v2956_v16 = vld [vmem:[#allocation9 + $0x1c4] ss:$16 sps:$4 sm:$0xff]  }
 0x145   :  { %1235 = vmatpush1.bf16.msra.mxu1 %v2864_v17  ;;  %1195 = vmatprep.subr.bf16.mxu0 %v2869_v18  ;;  %v2954_v17 = vld [vmem:[#allocation9 + $0x1c0] ss:$16 sps:$4 sm:$0xff]   ;;  %v2959_v18 = vld [vmem:[#allocation9 + $0x1a4] ss:$16 sps:$4 sm:$0xff]  }
 0x146   :  { %1236 = vmatprep.subr.bf16.mxu1 %v2872_v19  ;;  %v2957_v19 = vld [vmem:[#allocation9 + $0x1a0] ss:$16 sps:$4 sm:$0xff]  }
 0x148   :  { %1196 = vmatpush1.bf16.msra.mxu0 %v2867_v20  ;;  %v2962_v20 = vld [vmem:[#allocation9 + $0x184] ss:$16 sps:$4 sm:$0xff]  }
 0x149   :  { %1237 = vmatpush1.bf16.msra.mxu1 %v2870_v21  ;;  %1197 = vmatprep.subr.bf16.mxu0 %v2875_v22  ;;  %v2960_v21 = vld [vmem:[#allocation9 + $0x180] ss:$16 sps:$4 sm:$0xff]   ;;  %v2965_v22 = vld [vmem:[#allocation9 + $0x164] ss:$16 sps:$4 sm:$0xff]  }
 0x14a   :  { %1238 = vmatprep.subr.bf16.mxu1 %v2878_v23  ;;  %v2975_v23 = vld [vmem:[#allocation9 + $0x2e0] ss:$16 sps:$4 sm:$0xff]  }
 0x14c   :  { %1198 = vmatpush1.bf16.msra.mxu0 %v2873_v24  ;;  %v2977_v24 = vld [vmem:[#allocation9 + $0x2e4] ss:$16 sps:$4 sm:$0xff]  }
 0x14d   :  { %1239 = vmatpush1.bf16.msra.mxu1 %v2876_v25  ;;  %1199 = vmatprep.subr.bf16.mxu0 %v2881_v26  ;;  %v2963_v25 = vld [vmem:[#allocation9 + $0x160] ss:$16 sps:$4 sm:$0xff]   ;;  %v2968_v26 = vld [vmem:[#allocation9 + $0x144] ss:$16 sps:$4 sm:$0xff]  }
 0x14e   :  { %1240 = vmatprep.subr.bf16.mxu1 %v2884_v27  ;;  %v2981_v27 = vld [vmem:[#allocation9 + $0x2c0] ss:$16 sps:$4 sm:$0xff]  }
 0x150   :  { %1200 = vmatpush2.bf16.msra.mxu0 %v2879_v28  ;;  %v2983_v28 = vld [vmem:[#allocation9 + $0x2c4] ss:$16 sps:$4 sm:$0xff]  }
 0x151   :  { %1241 = vmatpush2.bf16.msra.mxu1 %v2882_v29  ;;  %1201 = vmatprep.subr.bf16.mxu0 %v2887_v30  ;;  %v2966_v29 = vld [vmem:[#allocation9 + $0x140] ss:$16 sps:$4 sm:$0xff]   ;;  %v2971_v30 = vld [vmem:[#allocation9 + $0x124] ss:$16 sps:$4 sm:$0xff]  }
 0x152   :  { %1242 = vmatprep.subr.bf16.mxu1 %v2890_v31  ;;  %v2987_v31 = vld [vmem:[#allocation9 + $0x2a0] ss:$16 sps:$4 sm:$0xff]  }
 0x154   :  { %1202 = vmatpush2.bf16.msra.mxu0 %v2885_v32  ;;  %v2989_v32 = vld [vmem:[#allocation9 + $0x2a4] ss:$16 sps:$4 sm:$0xff]  }
 0x155   :  { %1243 = vmatpush2.bf16.msra.mxu1 %v2888_v33  ;;  %1203 = vmatprep.subr.bf16.mxu0 %v2893_v34  ;;  %v2969_v33 = vld [vmem:[#allocation9 + $0x120] ss:$16 sps:$4 sm:$0xff]   ;;  %v2974_v34 = vld [vmem:[#allocation9 + $0x104] ss:$16 sps:$4 sm:$0xff]  }
 0x156   :  { %1244 = vmatprep.subr.bf16.mxu1 %v2896_v35  ;;  %v2993_v35 = vld [vmem:[#allocation9 + $0x280] ss:$16 sps:$4 sm:$0xff]  }
 0x158   :  { %1204 = vmatpush2.bf16.msra.mxu0 %v2891_v36  ;;  %v2995_v36 = vld [vmem:[#allocation9 + $0x284] ss:$16 sps:$4 sm:$0xff]  }
 0x159   :  { %1245 = vmatpush2.bf16.msra.mxu1 %v2894_v37  ;;  %1205 = vmatprep.subr.bf16.mxu0 %v2899_v38  ;;  %v2972_v37 = vld [vmem:[#allocation9 + $0x100] ss:$16 sps:$4 sm:$0xff]   ;;  %v2980_v38 = vld [vmem:[#allocation9 + $0xec] ss:$16 sps:$4 sm:$0xff]  }
 0x15a   :  { %1246 = vmatprep.subr.bf16.mxu1 %v2902_v39  ;;  %v2999_v39 = vld [vmem:[#allocation9 + $0x260] ss:$16 sps:$4 sm:$0xff]  }
 0x15c   :  { %1206 = vmatpush2.bf16.msra.mxu0 %v2897_v40  ;;  %v3001_v40 = vld [vmem:[#allocation9 + $0x264] ss:$16 sps:$4 sm:$0xff]  }
 0x15d   :  { %1247 = vmatpush2.bf16.msra.mxu1 %v2900_v41  ;;  %1207 = vmatprep.subr.bf16.mxu0 %v2905_v42  ;;  %v3007_v41 = vld [vmem:[#allocation9 + $0x244] ss:$16 sps:$4 sm:$0xff]   ;;  %v3005_v42 = vld [vmem:[#allocation9 + $0x240] ss:$16 sps:$4 sm:$0xff]  }
 0x15e   :  { %1248 = vmatprep.subr.bf16.mxu1 %v2908_v43  ;;  %v3013_v43 = vld [vmem:[#allocation9 + $0x224] ss:$16 sps:$4 sm:$0xff]  }
 0x160   :  { %1208 = vmatpush2.bf16.msra.mxu0 %v2903_v44  ;;  %v3011_v44 = vld [vmem:[#allocation9 + $0x220] ss:$16 sps:$4 sm:$0xff]  }
 0x161   :  { %1249 = vmatpush2.bf16.msra.mxu1 %v2906_v45  ;;  %1209 = vmatprep.subr.bf16.mxu0 %v2911_v46  ;;  %v3019_v45 = vld [vmem:[#allocation9 + $0x204] ss:$16 sps:$4 sm:$0xff]   ;;  %v3017_v46 = vld [vmem:[#allocation9 + $0x200] ss:$16 sps:$4 sm:$0xff]  }
 0x162   :  { %1250 = vmatprep.subr.bf16.mxu1 %v2914_v47  ;;  %v3025_v47 = vld [vmem:[#allocation9 + $0x3e4] ss:$16 sps:$4 sm:$0xff]  }
 0x164   :  { %1210 = vmatpush2.bf16.msra.mxu0 %v2909_v48  ;;  %v3023_v48 = vld [vmem:[#allocation9 + $0x3e0] ss:$16 sps:$4 sm:$0xff]  }
 0x165   :  { %1251 = vmatpush2.bf16.msra.mxu1 %v2912_v49  ;;  %1211 = vmatprep.subr.bf16.mxu0 %v2917_v50  ;;  %v3031_v49 = vld [vmem:[#allocation9 + $0x3c4] ss:$16 sps:$4 sm:$0xff]   ;;  %v3029_v50 = vld [vmem:[#allocation9 + $0x3c0] ss:$16 sps:$4 sm:$0xff]  }
 0x166   :  { %1252 = vmatprep.subr.bf16.mxu1 %v2920_v51  ;;  %v3037_v51 = vld [vmem:[#allocation9 + $0x3a4] ss:$16 sps:$4 sm:$0xff]  }
 0x168   :  { %1212 = vmatpush2.bf16.msra.mxu0 %v2915_v52  ;;  %v3035_v52 = vld [vmem:[#allocation9 + $0x3a0] ss:$16 sps:$4 sm:$0xff]  }
 0x169   :  { %1253 = vmatpush2.bf16.msra.mxu1 %v2918_v53  ;;  %1213 = vmatprep.subr.bf16.mxu0 %v2923_v55  ;;  %v3043_v53 = vld [vmem:[#allocation9 + $0x384] ss:$16 sps:$4 sm:$0xff]   ;;  %v3041_v55 = vld [vmem:[#allocation9 + $0x380] ss:$16 sps:$4 sm:$0xff]  }
 0x16a   :  { %1254 = vmatprep.subr.bf16.mxu1 %v2926_v56  ;;  %v3049_v56 = vld [vmem:[#allocation9 + $0x364] ss:$16 sps:$4 sm:$0xff]  }
 0x16c   :  { %1214 = vmatpush2.bf16.msra.mxu0 %v2921_v58  ;;  %v3047_v58 = vld [vmem:[#allocation9 + $0x360] ss:$16 sps:$4 sm:$0xff]  }
 0x16d   :  { %1255 = vmatpush2.bf16.msra.mxu1 %v2924_v59  ;;  %2083 = vmatprep.subr.bf16.mxu0 %v2929_v60  ;;  %v3055_v59 = vld [vmem:[#allocation9 + $0x344] ss:$16 sps:$4 sm:$0xff]   ;;  %v3053_v60 = vld [vmem:[#allocation9 + $0x340] ss:$16 sps:$4 sm:$0xff]  }
 0x16e   :  { %2124 = vmatprep.subr.bf16.mxu1 %v2977_v24 }
 0x16f   :  { %1216 = vmatmul.mubr.bf16.vlgmr.msra.gmra.mxu0 %v3388_v54  ;;  %v2942_v54 = vld [vmem:[#allocation9 + $0x40] ss:$16 sps:$4 sm:$0xff]  }
 0x170   :  { %1257 = vmatmul.mubr.bf16.vlgmr.msra.gmra.mxu1 %v3390_v57  ;;  %2084 = vmatpush1.bf16.msra.mxu0 %v2927_v61  ;;  %v2947_v57 = vld [vmem:[#allocation9 + $0x24] ss:$16 sps:$4 sm:$0xff]  }
 0x171   :  { %2085 = vmatprep.subr.bf16.mxu0 %v2932_v62  ;;  %2125 = vmatpush1.bf16.msra.mxu1 %v2975_v23  ;;  %v3061_v61 = vld [vmem:[#allocation9 + $0x324] ss:$16 sps:$4 sm:$0xff]   ;;  %v3059_v62 = vld [vmem:[#allocation9 + $0x320] ss:$16 sps:$4 sm:$0xff]  }
 0x172   :  { %2126 = vmatprep.subr.bf16.mxu1 %v2983_v28 }
 0x174   :  { %2086 = vmatpush1.bf16.msra.mxu0 %v2930_v63  ;;  %v3067_v63 = vld [vmem:[#allocation9 + $0x304] ss:$16 sps:$4 sm:$0xff]  }
 0x175   :  { %2087 = vmatprep.subr.bf16.mxu0 %v2935_v0  ;;  %2127 = vmatpush1.bf16.msra.mxu1 %v2981_v27  ;;  %v3065_v0 = vld [vmem:[#allocation9 + $0x300] ss:$16 sps:$4 sm:$0xff]  }
 0x176   :  { %2128 = vmatprep.subr.bf16.mxu1 %v2989_v32  ;;  %v2978_v32 = vld [vmem:[#allocation9 + $0xe8] ss:$16 sps:$4 sm:$0xff]  }
 0x178   :  { %2088 = vmatpush1.bf16.msra.mxu0 %v2933_v1  ;;  %v3073_v1 = vld [vmem:[#allocation9 + $0x2ec] ss:$16 sps:$4 sm:$0xff]  }
 0x179   :  { %2089 = vmatprep.subr.bf16.mxu0 %v2938_v2  ;;  %2129 = vmatpush1.bf16.msra.mxu1 %v2987_v31  ;;  %v3399_v2 = vld [vmem:[%s3442_s4] sm:$0xf] }
 0x17a   :  { %2130 = vmatprep.subr.bf16.mxu1 %v2995_v36  ;;  %v2992_v36 = vld [vmem:[#allocation9 + $0xac] ss:$16 sps:$4 sm:$0xff]  }
 0x17c   :  { %2090 = vmatpush1.bf16.msra.mxu0 %v2936_v3  ;;  %v444_v3 = vrot.slane %v3399_v2, %v3373_v11 }
 0x17d   :  { %2091 = vmatprep.subr.bf16.mxu0 %v2941_v4  ;;  %2131 = vmatpush1.bf16.msra.mxu1 %v2993_v35  ;;  %v448_v4 = vrot.slane %v3399_v2, %v3380_v14  ;;  %v2984_v35 = vld [vmem:[#allocation9 + $0xc8] ss:$16 sps:$4 sm:$0xff]  }
 0x17e   :  { %2132 = vmatprep.subr.bf16.mxu1 %v3001_v40  ;;  %v3004_v40 = vld [vmem:[#allocation9 + $0x6c] ss:$16 sps:$4 sm:$0xff]  }
 0x180   :  { %2092 = vmatpush1.bf16.msra.mxu0 %v2939_v5 }
 0x181   :  { %2093 = vmatprep.subr.bf16.mxu0 %v2944_v6  ;;  %2133 = vmatpush1.bf16.msra.mxu1 %v2999_v39  ;;  %v2996_v39 = vld [vmem:[#allocation9 + $0x88] ss:$16 sps:$4 sm:$0xff]  }
 0x182   :  { %2134 = vmatprep.subr.bf16.mxu1 %v3007_v41  ;;  %v3002_v41 = vld [vmem:[#allocation9 + $0x68] ss:$16 sps:$4 sm:$0xff]  }
 0x184   :  { %2094 = vmatpush1.bf16.msra.mxu0 %v2942_v54 }
 0x185   :  { %2095 = vmatprep.subr.bf16.mxu0 %v2947_v57  ;;  %2135 = vmatpush1.bf16.msra.mxu1 %v3005_v42  ;;  %v3010_v42 = vld [vmem:[#allocation9 + $0x4c] ss:$16 sps:$4 sm:$0xff]  }
 0x186   :  { %2136 = vmatprep.subr.bf16.mxu1 %v3013_v43  ;;  %v452_v43 = vrot.slane %v3399_v2, %v3375_v12 }
 0x188   :  { %2096 = vmatpush1.bf16.msra.mxu0 %v2945_v7 }
 0x189   :  { %2097 = vmatprep.subr.bf16.mxu0 %v2950_v8  ;;  %2137 = vmatpush1.bf16.msra.mxu1 %v3011_v44  ;;  %v456_v44 = vrot.slane %v3399_v2, %v3382_v15  ;;  %v3020_v2 = vld [vmem:[#allocation9 + $0x8] ss:$16 sps:$4 sm:$0xff]  }
 0x18a   :  { %2138 = vmatprep.subr.bf16.mxu1 %v3019_v45  ;;  %v3008_v45 = vld [vmem:[#allocation9 + $0x48] ss:$16 sps:$4 sm:$0xff]  }
 0x18c   :  { %2098 = vmatpush1.bf16.msra.mxu0 %v2948_v9 }
 0x18d   :  { %2099 = vmatprep.subr.bf16.mxu0 %v2953_v10  ;;  %2139 = vmatpush1.bf16.msra.mxu1 %v3017_v46 }
 0x18e   :  { %2140 = vmatprep.subr.bf16.mxu1 %v3025_v47  ;;  %v3016_v47 = vld [vmem:[#allocation9 + $0x2c] ss:$16 sps:$4 sm:$0xff]  }
 0x190   :  { %2100 = vmatpush2.bf16.msra.mxu0 %v2951_v13 }
 0x191   :  { %2101 = vmatprep.subr.bf16.mxu0 %v2956_v16  ;;  %2141 = vmatpush2.bf16.msra.mxu1 %v3023_v48 }
 0x192   :  { %2142 = vmatprep.subr.bf16.mxu1 %v3031_v49 }
 0x194   :  { %2102 = vmatpush2.bf16.msra.mxu0 %v2954_v17 }
 0x195   :  { %2103 = vmatprep.subr.bf16.mxu0 %v2959_v18  ;;  %2143 = vmatpush2.bf16.msra.mxu1 %v3029_v50 }
 0x196   :  { %2144 = vmatprep.subr.bf16.mxu1 %v3037_v51 }
 0x198   :  { %2104 = vmatpush2.bf16.msra.mxu0 %v2957_v19 }
 0x199   :  { %2105 = vmatprep.subr.bf16.mxu0 %v2962_v20  ;;  %2145 = vmatpush2.bf16.msra.mxu1 %v3035_v52 }
 0x19a   :  { %2146 = vmatprep.subr.bf16.mxu1 %v3043_v53 }
 0x19c   :  { %2106 = vmatpush2.bf16.msra.mxu0 %v2960_v21 }
 0x19d   :  { %2107 = vmatprep.subr.bf16.mxu0 %v2965_v22  ;;  %2147 = vmatpush2.bf16.msra.mxu1 %v3041_v55  ;;  %v3014_v55 = vld [vmem:[#allocation9 + $0x28] ss:$16 sps:$4 sm:$0xff]  }
 0x19e   :  { %2148 = vmatprep.subr.bf16.mxu1 %v3049_v56 }
 0x1a0   :  { %2108 = vmatpush2.bf16.msra.mxu0 %v2963_v25 }
 0x1a1   :  { %2109 = vmatprep.subr.bf16.mxu0 %v2968_v26  ;;  %2149 = vmatpush2.bf16.msra.mxu1 %v3047_v58  ;;  %v3022_v58 = vld [vmem:[#allocation9 + $0xc] ss:$16 sps:$4 sm:$0xff]  }
 0x1a2   :  { %2150 = vmatprep.subr.bf16.mxu1 %v3055_v59 }
 0x1a4   :  { %2110 = vmatpush2.bf16.msra.mxu0 %v2966_v29 }
 0x1a5   :  { %2111 = vmatprep.subr.bf16.mxu0 %v2971_v30  ;;  %2151 = vmatpush2.bf16.msra.mxu1 %v3053_v60 }
 0x1a6   :  { %2152 = vmatprep.subr.bf16.mxu1 %v3061_v61 }
 0x1a8   :  { %2112 = vmatpush2.bf16.msra.mxu0 %v2969_v33 }
 0x1a9   :  { %2113 = vmatprep.subr.bf16.mxu0 %v2974_v34  ;;  %2153 = vmatpush2.bf16.msra.mxu1 %v3059_v62  ;;  %v2986_v34 = vld [vmem:[#allocation9 + $0xcc] ss:$16 sps:$4 sm:$0xff]  }
 0x1aa   :  { %2154 = vmatprep.subr.bf16.mxu1 %v3067_v63 }
 0x1ac   :  { %2114 = vmatpush2.bf16.msra.mxu0 %v2972_v37  ;;  %v2990_v37 = vld [vmem:[#allocation9 + $0xa8] ss:$16 sps:$4 sm:$0xff]  }
 0x1ad   :  { %2165 = vmatprep.subr.bf16.mxu0 %v2980_v38  ;;  %2155 = vmatpush2.bf16.msra.mxu1 %v3065_v0  ;;  %v2998_v38 = vld [vmem:[#allocation9 + $0x8c] ss:$16 sps:$4 sm:$0xff]  }
 0x1ae   :  { %2206 = vmatprep.subr.bf16.mxu1 %v3073_v1 }
 0x1ef   :  { %v1135_v5 = vpop.f32.mrf.mxu0 }
 0x1f0   :  { %v1136_v6 = vadd.f32 %v1135_v5, %v444_v3  ;;  %v1176_v54 = vpop.f32.mrf.mxu1  ;;  %v3028_v3 = vld [vmem:[#allocation9 + $0x1ec] ss:$16 sps:$4 sm:$0xff]   ;;  %v3026_v5 = vld [vmem:[#allocation9 + $0x1e8] ss:$16 sps:$4 sm:$0xff]  }
 0x1f1   :  { %v1137_v57 = vpop.f32.mrf.mxu0 }
 0x1f2   :  { %v1177_v7 = vadd.f32 %v1176_v54, %v1136_v6  ;;  %v1138_v8 = vadd.f32 %v1137_v57, %v448_v4  ;;  %v1178_v9 = vpop.f32.mrf.mxu1  ;;  %v3034_v6 = vld [vmem:[#allocation9 + $0x1cc] ss:$16 sps:$4 sm:$0xff]   ;;  %v3032_v54 = vld [vmem:[#allocation9 + $0x1c8] ss:$16 sps:$4 sm:$0xff]  }
 0x1f3   :  { %v1139_v10 = vpop.f32.mrf.mxu0  ;;  %v3040_v57 = vld [vmem:[#allocation9 + $0x1ac] ss:$16 sps:$4 sm:$0xff]  }
 0x1f4   :  { %v1265_v13 = vsub.f32 0.0, %v1177_v7  ;;  %v1179_v16 = vadd.f32 %v1178_v9, %v1138_v8  ;;  %v1180_v17 = vpop.f32.mrf.mxu1  ;;  %v3046_v8 = vld [vmem:[#allocation9 + $0x18c] ss:$16 sps:$4 sm:$0xff]  }
 0x1f5   :  { %v1140_v18 = vpop.f32.mrf.mxu0  ;;  %v3052_v17 = vld [vmem:[#allocation9 + $0x16c] ss:$16 sps:$4 sm:$0xff]  }
 0x1f6   :  { %v1269_v19 = vmul.f32 1.442695, %v1265_v13  ;;  %v1266_v20 = vsub.f32 0.0, %v1179_v16  ;;  %v1181_v21 = vpop.f32.mrf.mxu1  ;;  %v3044_v13 = vld [vmem:[#allocation9 + $0x188] ss:$16 sps:$4 sm:$0xff]  }
 0x1f7   :  { %v3056_v21 = vld [vmem:[#allocation9 + $0x148] ss:$16 sps:$4 sm:$0xff]  }
 0x1f8   :  { %3135 = vpow2.f32 %v1269_v19  ;;  %v1271_v22 = vmul.f32 1.442695, %v1266_v20  ;;  %v3050_v19 = vld [vmem:[#allocation9 + $0x168] ss:$16 sps:$4 sm:$0xff]   ;;  %v3058_v20 = vld [vmem:[#allocation9 + $0x14c] ss:$16 sps:$4 sm:$0xff]  }
 0x1fa   :  { %3137 = vpow2.f32 %v1271_v22  ;;  %v3064_v22 = vld [vmem:[#allocation9 + $0x12c] ss:$16 sps:$4 sm:$0xff]  }
 0x205   :  { %v3136_v23 = vpop.eup %3135 }
 0x206   :  { %v1277_v24 = vadd.f32 1.0, %v3136_v23  ;;  %v3062_v23 = vld [vmem:[#allocation9 + $0x128] ss:$16 sps:$4 sm:$0xff]  }
 0x207   :  { %v3138_v25 = vpop.eup %3137 }
 0x208   :  { %3139 = vrcp.f32 %v1277_v24  ;;  %v1278_v26 = vadd.f32 1.0, %v3138_v25  ;;  %v3070_v24 = vld [vmem:[#allocation9 + $0x10c] ss:$16 sps:$4 sm:$0xff]  }
 0x20a   :  { %3141 = vrcp.f32 %v1278_v26  ;;  %v3068_v26 = vld [vmem:[#allocation9 + $0x108] ss:$16 sps:$4 sm:$0xff]  }
 0x215   :  { %v3140_v27 = vpop.eup %3139 }
 0x216   :  { %v1285_v29 = vmul.f32 %v3140_v27, %v1177_v7  ;;  %v3038_v7 = vld [vmem:[#allocation9 + $0x1a8] ss:$16 sps:$4 sm:$0xff]  }
 0x217   :  { %v3142_v28 = vpop.eup %3141 }
 0x218   :  { %v1286_v30 = vmul.f32 %v3142_v28, %v1179_v16  ;;  %v3405_v33 = vpack.c.bf16 %v1285_v29, %v1285_v29 }
 0x21a   :  { %v1290_v31 = vpack.c.bf16 %v1286_v30, %v1286_v30 }
 0x21c   :  { %2115 = vmatprep.mubr.bf16.mxu0 %v1290_v31 }
 0x21d   :  { %2116 = vmatmul.mubr.bf16.vlgmr.msra.gmra.mxu0 %v3405_v33 }
 0x21e   :  { %2166 = vmatpush1.bf16.msra.mxu0 %v2978_v32  ;;  %2197 = vmatprep.mubr.bf16.mxu0 %v1290_v31  ;;  %v3071_v31 = vld [vmem:[#allocation9 + $0x2e8] ss:$16 sps:$4 sm:$0xff]  }
 0x21f   :  { %2167 = vmatprep.subr.bf16.mxu0 %v2986_v34  ;;  %v3076_v34 = vld [vmem:[#allocation9 + $0x2cc] ss:$16 sps:$4 sm:$0xff]  }
 0x222   :  { %2168 = vmatpush1.bf16.msra.mxu0 %v2984_v35  ;;  %v3074_v35 = vld [vmem:[#allocation9 + $0x2c8] ss:$16 sps:$4 sm:$0xff]  }
 0x223   :  { %2169 = vmatprep.subr.bf16.mxu0 %v2992_v36  ;;  %v3079_v36 = vld [vmem:[#allocation9 + $0x2ac] ss:$16 sps:$4 sm:$0xff]  }
 0x226   :  { %2170 = vmatpush1.bf16.msra.mxu0 %v2990_v37  ;;  %v3077_v37 = vld [vmem:[#allocation9 + $0x2a8] ss:$16 sps:$4 sm:$0xff]  }
 0x227   :  { %2171 = vmatprep.subr.bf16.mxu0 %v2998_v38  ;;  %v3082_v38 = vld [vmem:[#allocation9 + $0x28c] ss:$16 sps:$4 sm:$0xff]  }
 0x22a   :  { %2172 = vmatpush1.bf16.msra.mxu0 %v2996_v39  ;;  %v3080_v39 = vld [vmem:[#allocation9 + $0x288] ss:$16 sps:$4 sm:$0xff]  }
 0x22b   :  { %2173 = vmatprep.subr.bf16.mxu0 %v3004_v40  ;;  %v3085_v40 = vld [vmem:[#allocation9 + $0x26c] ss:$16 sps:$4 sm:$0xff]  }
 0x22e   :  { %2174 = vmatpush1.bf16.msra.mxu0 %v3002_v41  ;;  %v3083_v41 = vld [vmem:[#allocation9 + $0x268] ss:$16 sps:$4 sm:$0xff]  }
 0x22f   :  { %v1217_v46 = vpop.f32.mrf.mxu0  ;;  %2175 = vmatprep.subr.bf16.mxu0 %v3010_v42  ;;  %v3088_v42 = vld [vmem:[#allocation9 + $0x24c] ss:$16 sps:$4 sm:$0xff]  }
 0x230   :  { %v1218_v48 = vadd.f32 %v1217_v46, %v452_v43  ;;  %v1258_v49 = vpop.f32.mrf.mxu1  ;;  %v3086_v43 = vld [vmem:[#allocation9 + $0x248] ss:$16 sps:$4 sm:$0xff]  }
 0x231   :  { %v1219_v50 = vpop.f32.mrf.mxu0  ;;  %v3092_v46 = vld [vmem:[#allocation9 + $0x208] ss:$16 sps:$4 sm:$0xff]  }
 0x232   :  { %v1259_v51 = vadd.f32 %v1258_v49, %v1218_v48  ;;  %v1220_v52 = vadd.f32 %v1219_v50, %v456_v44  ;;  %v1260_v53 = vpop.f32.mrf.mxu1  ;;  %2176 = vmatpush1.bf16.msra.mxu0 %v3008_v45  ;;  %v3089_v44 = vld [vmem:[#allocation9 + $0x228] ss:$16 sps:$4 sm:$0xff]   ;;  %v3094_v45 = vld [vmem:[#allocation9 + $0x20c] ss:$16 sps:$4 sm:$0xff]  }
 0x233   :  { %v1221_v56 = vpop.f32.mrf.mxu0  ;;  %2177 = vmatprep.subr.bf16.mxu0 %v3016_v47  ;;  %v3097_v47 = vld [vmem:[#allocation9 + $0x3ec] ss:$16 sps:$4 sm:$0xff]   ;;  %v3095_v48 = vld [vmem:[#allocation9 + $0x3e8] ss:$16 sps:$4 sm:$0xff]  }
 0x234   :  { %v1267_v59 = vsub.f32 0.0, %v1259_v51  ;;  %v1261_v60 = vadd.f32 %v1260_v53, %v1220_v52  ;;  %v1262_v61 = vpop.f32.mrf.mxu1  ;;  %v3100_v49 = vld [vmem:[#allocation9 + $0x3cc] ss:$16 sps:$4 sm:$0xff]   ;;  %v3098_v50 = vld [vmem:[#allocation9 + $0x3c8] ss:$16 sps:$4 sm:$0xff]  }
 0x235   :  { %v1222_v62 = vpop.f32.mrf.mxu0  ;;  %v3101_v52 = vld [vmem:[#allocation9 + $0x3a8] ss:$16 sps:$4 sm:$0xff]   ;;  %v3106_v53 = vld [vmem:[#allocation9 + $0x38c] ss:$16 sps:$4 sm:$0xff]  }
 0x236   :  { %v1273_v63 = vmul.f32 1.442695, %v1267_v59  ;;  %v1268_v0 = vsub.f32 0.0, %v1261_v60  ;;  %v1263_v1 = vpop.f32.mrf.mxu1  ;;  %2178 = vmatpush1.bf16.msra.mxu0 %v3014_v55  ;;  %v3104_v55 = vld [vmem:[#allocation9 + $0x388] ss:$16 sps:$4 sm:$0xff]  }
 0x237   :  { %2179 = vmatprep.subr.bf16.mxu0 %v3022_v58  ;;  %v3109_v56 = vld [vmem:[#allocation9 + $0x36c] ss:$16 sps:$4 sm:$0xff]   ;;  %v3107_v58 = vld [vmem:[#allocation9 + $0x368] ss:$16 sps:$4 sm:$0xff]  }
 0x238   :  { %3143 = vpow2.f32 %v1273_v63  ;;  %v1275_v4 = vmul.f32 1.442695, %v1268_v0  ;;  %v3112_v59 = vld [vmem:[#allocation9 + $0x34c] ss:$16 sps:$4 sm:$0xff]   ;;  %v3113_v62 = vld [vmem:[#allocation9 + $0x328] ss:$16 sps:$4 sm:$0xff]  }
 0x239   :  { %v3115_v61 = vld [vmem:[#allocation9 + $0x32c] ss:$16 sps:$4 sm:$0xff]   ;;  %v3116_v0 = vld [vmem:[#allocation9 + $0x308] ss:$16 sps:$4 sm:$0xff]  }
 0x23a   :  { %3145 = vpow2.f32 %v1275_v4  ;;  %2180 = vmatpush1.bf16.msra.mxu0 %v3020_v2  ;;  %v3118_v63 = vld [vmem:[#allocation9 + $0x30c] ss:$16 sps:$4 sm:$0xff]  }
 0x23b   :  { %2181 = vmatprep.subr.bf16.mxu0 %v3028_v3 }
 0x23e   :  { %2182 = vmatpush2.bf16.msra.mxu0 %v3026_v5  ;;  %v3417_v5 = vld [vmem:[#allocation11] sm:$0xf] }
 0x23f   :  { %2183 = vmatprep.subr.bf16.mxu0 %v3034_v6  ;;  %v2290_v6 = vrot.slane %v3417_v5, %v3380_v14 }
 0x242   :  { %2184 = vmatpush2.bf16.msra.mxu0 %v3032_v54  ;;  %v2298_v54 = vrot.slane %v3417_v5, %v3382_v15 }
 0x243   :  { %2185 = vmatprep.subr.bf16.mxu0 %v3040_v57  ;;  %v2272_v57 = vld [vmem:[#allocation2] sm:$0x1] }
 0x245   :  { %v3144_v9 = vpop.eup %3143 }
 0x246   :  { %v1279_v10 = vadd.f32 1.0, %v3144_v9  ;;  %2186 = vmatpush2.bf16.msra.mxu0 %v3038_v7  ;;  %v3303_v7 = vmov 0  }
 0x247   :  { %v3146_v16 = vpop.eup %3145  ;;  %2187 = vmatprep.subr.bf16.mxu0 %v3046_v8  ;;  %2734 = vset.pattern.permute.xlu0 %v3303_v7  ;;  %v1421_v8 = vld [vmem:[%s3444_s6] sm:$0xf]  ;;  %s3304_s6 = smov [#allocation12]  }
 0x248   :  { %3147 = vrcp.f32 %v1279_v10  ;;  %v1280_v18 = vadd.f32 1.0, %v3146_v16  ;;  %2275 = vperm.xlu0 %2734, %v2272_v57   ;;  %v1426_v9 = vrot.slane %v1421_v8, %v3373_v11  ;;  %v1430_v10 = vrot.slane %v1421_v8, %v3380_v14  ;;  %s2451_s15 = sshll.u32 %s3304_s6, 4  ;;  %s2452_s15 = int_to_ptr.vmem [resolvable:$true] %s2451_s15 }
 0x249   :  { %s3267_s8 = scalar_lea.vmem %s2452_s15, 16  ;;  %s3271_s16 = scalar_lea.vmem %s2452_s15, 32 }
 0x24a   :  { %3149 = vrcp.f32 %v1280_v18  ;;  %2188 = vmatpush2.bf16.msra.mxu0 %v3044_v13  ;;  %p3268_p11 = scmp.ne.s32.totalorder %s2452_s15, %s3267_s8  ;;  %p3272_p12 = scmp.lt.s32.totalorder %s2452_s15, %s2452_s15 }
 0x24b   :  { %2189 = vmatprep.subr.bf16.mxu0 %v3052_v17  ;;  %p3273_p13 = scmp.lt.s32.totalorder %s3271_s16, %s3267_s8 }
 0x24d   :  { %p3274_p0 = por %p3273_p13, %p3272_p12 }
 0x24e   :  { %2190 = vmatpush2.bf16.msra.mxu0 %v3050_v19 }
 0x24f   :  { %2191 = vmatprep.subr.bf16.mxu0 %v3058_v20  ;;  %p3275_p1 = pnand %p3274_p0, %p3268_p11 }
 0x252   :  { %2192 = vmatpush2.bf16.msra.mxu0 %v3056_v21 }
 0x253   :  { %2193 = vmatprep.subr.bf16.mxu0 %v3064_v22 }
 0x255   :  { %v3148_v25 = vpop.eup %3147 }
 0x256   :  { %2194 = vmatpush2.bf16.msra.mxu0 %v3062_v23  ;;  %v1287_v28 = vmul.f32 %v3148_v25, %v1259_v51  ;;  %v3103_v51 = vld [vmem:[#allocation9 + $0x3ac] ss:$16 sps:$4 sm:$0xff]  }
 0x257   :  { %v3150_v27 = vpop.eup %3149  ;;  %2195 = vmatprep.subr.bf16.mxu0 %v3070_v24 }
 0x258   :  { %v1288_v29 = vmul.f32 %v3150_v27, %v1261_v60  ;;  %v3412_v32 = vpack.c.bf16 %v1287_v28, %v1287_v28  ;;  %v3110_v60 = vld [vmem:[#allocation9 + $0x348] ss:$16 sps:$4 sm:$0xff]  }
 0x25a   :  { %v1292_v30 = vpack.c.bf16 %v1288_v29, %v1288_v29  ;;  %2196 = vmatpush2.bf16.msra.mxu0 %v3068_v26 }
 0x25c   :  { %2156 = vmatprep.mubr.bf16.mxu1 %v1292_v30 }
 0x25d   :  { %2157 = vmatmul.mubr.bf16.vlgmr.msra.gmra.mxu1 %v3412_v32  ;;  %2198 = vmatmul.mubr.bf16.vlgmr.msra.gmra.mxu0 %v3405_v33  ;;  %v3091_v33 = vld [vmem:[#allocation9 + $0x22c] ss:$16 sps:$4 sm:$0xff]  }
 0x25e   :  { %2207 = vmatpush1.bf16.msra.mxu1 %v3071_v31  ;;  %2238 = vmatprep.mubr.bf16.mxu1 %v1292_v30 }
 0x25f   :  { %2208 = vmatprep.subr.bf16.mxu1 %v3076_v34  ;;  %2367 = vmatprep.mubr.f32.mxu0 %v2290_v6 }
 0x262   :  { %2209 = vmatpush1.bf16.msra.mxu1 %v3074_v35 }
 0x263   :  { %2210 = vmatprep.subr.bf16.mxu1 %v3079_v36 }
 0x266   :  { %2211 = vmatpush1.bf16.msra.mxu1 %v3077_v37 }
 0x267   :  { %2212 = vmatprep.subr.bf16.mxu1 %v3082_v38 }
 0x26a   :  { %2213 = vmatpush1.bf16.msra.mxu1 %v3080_v39  ;;  %v2286_v39 = vrot.slane %v3417_v5, %v3373_v11 }
 0x26b   :  { %2214 = vmatprep.subr.bf16.mxu1 %v3085_v40  ;;  %v1434_v40 = vrot.slane %v1421_v8, %v3375_v12 }
 0x26e   :  { %2215 = vmatpush1.bf16.msra.mxu1 %v3083_v41  ;;  %v1438_v41 = vrot.slane %v1421_v8, %v3382_v15 }
 0x26f   :  { %2216 = vmatprep.subr.bf16.mxu1 %v3088_v42 }
 0x272   :  { %2217 = vmatpush1.bf16.msra.mxu1 %v3086_v43 }
 0x273   :  { %2218 = vmatprep.subr.bf16.mxu1 %v3091_v33 }
 0x276   :  { %2219 = vmatpush1.bf16.msra.mxu1 %v3089_v44 }
 0x277   :  { %2220 = vmatprep.subr.bf16.mxu1 %v3094_v45 }
 0x27a   :  { %2221 = vmatpush1.bf16.msra.mxu1 %v3092_v46 }
 0x27b   :  { %2222 = vmatprep.subr.bf16.mxu1 %v3097_v47 }
 0x27e   :  { %2223 = vmatpush2.bf16.msra.mxu1 %v3095_v48 }
 0x27f   :  { %2224 = vmatprep.subr.bf16.mxu1 %v3100_v49 }
 0x282   :  { %2225 = vmatpush2.bf16.msra.mxu1 %v3098_v50 }
 0x283   :  { %2226 = vmatprep.subr.bf16.mxu1 %v3103_v51 }
 0x286   :  { %2227 = vmatpush2.bf16.msra.mxu1 %v3101_v52 }
 0x287   :  { %2228 = vmatprep.subr.bf16.mxu1 %v3106_v53 }
 0x28a   :  { %2229 = vmatpush2.bf16.msra.mxu1 %v3104_v55 }
 0x28b   :  { %2230 = vmatprep.subr.bf16.mxu1 %v3109_v56 }
 0x28e   :  { %2231 = vmatpush2.bf16.msra.mxu1 %v3107_v58 }
 0x28f   :  { %2232 = vmatprep.subr.bf16.mxu1 %v3112_v59 }
 0x292   :  { %2233 = vmatpush2.bf16.msra.mxu1 %v3110_v60 }
 0x293   :  { %2234 = vmatprep.subr.bf16.mxu1 %v3115_v61 }
 0x296   :  { %2235 = vmatpush2.bf16.msra.mxu1 %v3113_v62  ;;  %v2294_v62 = vrot.slane %v3417_v5, %v3375_v12 }
 0x297   :  { %2236 = vmatprep.subr.bf16.mxu1 %v3118_v63 }
 0x29a   :  { %2237 = vmatpush2.bf16.msra.mxu1 %v3116_v0 }
 0x29d   :  { %2239 = vmatmul.mubr.bf16.vlgmr.msra.gmra.mxu1 %v3412_v32 }
 0x29e   :  { %2437 = vmatprep.mubr.f32.mxu1 %v2298_v54 }
 0x2dd   :  { %v2117_v1 = vpop.f32.mrf.mxu0 }
 0x2de   :  { %v2118_v13 = vadd.f32 %v2117_v1, %v1426_v9  ;;  %v2276_v1 = vpop.permute.xlu0 %2275 }
 0x2df   :  { %v2119_v2 = vpop.f32.mrf.mxu0 }
 0x2e0   :  { %v2120_v18 = vadd.f32 %v2119_v2, %v1430_v10  ;;  %v2281_v2 = vrot.slane %v2276_v1, %v3373_v11 }
 0x2e1   :  { %v2121_v3 = vpop.f32.mrf.mxu0 }
 0x2e3   :  { %v2122_v4 = vpop.f32.mrf.mxu0 }
 0x31d   :  { %v2158_v16 = vpop.f32.mrf.mxu1  ;;  %v2199_v17 = vpop.f32.mrf.mxu0 }
 0x31e   :  { %v2159_v19 = vadd.f32 %v2158_v16, %v2118_v13  ;;  %v2200_v42 = vadd.f32 %v2199_v17, %v1434_v40 }
 0x31f   :  { %v2160_v20 = vpop.f32.mrf.mxu1  ;;  %v2201_v21 = vpop.f32.mrf.mxu0 }
 0x320   :  { %v2247_v22 = vsub.f32 0.0, %v2159_v19  ;;  %v2161_v23 = vadd.f32 %v2160_v20, %v2120_v18  ;;  %v2202_v33 = vadd.f32 %v2201_v21, %v1438_v41 }
 0x321   :  { %v2162_v24 = vpop.f32.mrf.mxu1  ;;  %v2203_v25 = vpop.f32.mrf.mxu0 }
 0x322   :  { %v2251_v26 = vmul.f32 1.442695, %v2247_v22  ;;  %v2248_v27 = vsub.f32 0.0, %v2161_v23 }
 0x323   :  { %v2163_v28 = vpop.f32.mrf.mxu1  ;;  %v2204_v29 = vpop.f32.mrf.mxu0 }
 0x324   :  { %3151 = vpow2.f32 %v2251_v26  ;;  %v2253_v30 = vmul.f32 1.442695, %v2248_v27 }
 0x326   :  { %3153 = vpow2.f32 %v2253_v30 }
 0x331   :  { %v3152_v31 = vpop.eup %3151 }
 0x332   :  { %v2259_v14 = vadd.f32 1.0, %v3152_v31 }
 0x333   :  { %v3154_v32 = vpop.eup %3153 }
 0x334   :  { %v2260_v34 = vadd.f32 1.0, %v3154_v32  ;;  %3155 = vrcp.f32 %v2259_v14 }
 0x336   :  { %3157 = vrcp.f32 %v2260_v34 }
 0x341   :  { %v3156_v35 = vpop.eup %3155 }
 0x342   :  { %v2267_v38 = vmul.f32 %v3156_v35, %v2159_v19 }
 0x343   :  { %v3158_v36 = vpop.eup %3157 }
 0x344   :  { %v2268_v37 = vmul.f32 %v3158_v36, %v2161_v23 }
 0x346   :  { %2333 = vmatprep.subr.mxu0 %v2268_v37 }
 0x347   :  { %2334 = vmatpush1.xpose.msra.mxu0 %v2267_v38 }
 0x34a   :  { %2368 = vmatmul.mubr.f32.vlgmr.msra.gmra.mxu0 %v2286_v39 }
 0x35d   :  { %v2240_v43 = vpop.f32.mrf.mxu1 }
 0x35e   :  { %v2241_v44 = vadd.f32 %v2240_v43, %v2200_v42 }
 0x35f   :  { %v2242_v45 = vpop.f32.mrf.mxu1 }
 0x360   :  { %v2249_v46 = vsub.f32 0.0, %v2241_v44  ;;  %v2243_v47 = vadd.f32 %v2242_v45, %v2202_v33 }
 0x361   :  { %v2244_v48 = vpop.f32.mrf.mxu1 }
 0x362   :  { %v2255_v49 = vmul.f32 1.442695, %v2249_v46  ;;  %v2250_v50 = vsub.f32 0.0, %v2243_v47 }
 0x363   :  { %v2245_v51 = vpop.f32.mrf.mxu1 }
 0x364   :  { %3159 = vpow2.f32 %v2255_v49  ;;  %v2257_v52 = vmul.f32 1.442695, %v2250_v50 }
 0x366   :  { %3161 = vpow2.f32 %v2257_v52 }
 0x371   :  { %v3160_v53 = vpop.eup %3159 }
 0x372   :  { %v2261_v55 = vadd.f32 1.0, %v3160_v53 }
 0x373   :  { %v3162_v56 = vpop.eup %3161 }
 0x374   :  { %v2262_v58 = vadd.f32 1.0, %v3162_v56  ;;  %3163 = vrcp.f32 %v2261_v55 }
 0x376   :  { %3165 = vrcp.f32 %v2262_v58 }
 0x381   :  { %v3164_v15 = vpop.eup %3163 }
 0x382   :  { %v2269_v61 = vmul.f32 %v3164_v15, %v2241_v44 }
 0x383   :  { %v3166_v59 = vpop.eup %3165 }
 0x384   :  { %v2270_v60 = vmul.f32 %v3166_v59, %v2243_v47 }
 0x386   :  { %2403 = vmatprep.subr.mxu1 %v2270_v60 }
 0x387   :  { %2404 = vmatpush1.xpose.msra.mxu1 %v2269_v61 }
 0x38a   :  { %2438 = vmatmul.mubr.f32.vlgmr.msra.gmra.mxu1 %v2294_v62 }
 0x40a   :  { %v2369_v63 = vpop.f32.mrf.mxu0 }
 0x40b   :  { %v2370_v3 = vadd.f32 %v2369_v63, %v2281_v2 }
 0x40c   :  { %v2371_v0 = vpop.f32.mrf.mxu0 }
 0x44a   :  { %v2439_v4 = vpop.f32.mrf.mxu1 }
 0x44b   :  { %v2440_v6 = vadd.f32 %v2439_v4, %v2370_v3 }
 0x44c   :  { %v2441_v54 = vpop.f32.mrf.mxu1 }
 0x44d   :  { %2444 = vst.msk [vmem:[#allocation12] sm:$0x1] %vm2443_vm2, %v2440_v6 }
 0x44e   :  { %3278 = shalt.err (!%p3275_p1)
}
 0x44f   :  { %2454 = dma.vmem_to_hbm [thread:$0]  %s2452_s15, 16, %s3447_s9, [#allocation5]  }
 0x450   :  { %3293 = dma.done.wait [#allocation5], 16  }
 0x451   :  { %3294 = vsyncadd [#allocation5], 4294967280 }
 0x452   :  { %2458 = vsyncpa [#allocation4], 1 }
 0x453   :  { %2459 = vsyncpa [#allocation7], 1 }
 0x454   :  { %2460 = vsyncpa [#allocation10], 1 }
 0x455   :  { %2461 = vsyncpa [#allocation5], 1 }

</bundles_post_ra>
